<compile_context>
chip_gen: v6e
topology: v6e:2x2x1
jax: 0.10.0
libtpu: 0.0.40
codegen_flags: <defaults>
</compile_context>

<pallas_src>
import functools
import math

import jax
import jax.numpy as jnp
from jax.experimental import pallas as pl
from jax.experimental.pallas import tpu as pltpu

EMBED_SIZE = 256
HEADS = 8
HEAD_DIM = EMBED_SIZE // HEADS  # 32


def _mha_kernel(x_ref, mask_ref, wq_ref, wk_ref, wv_ref, wo_ref, bo_ref, o_ref,
                *, heads, head_dim, embed_size, tq):
    """One grid step == one (batch element, query tile).

    x_ref    : (L, E)   full sequence for this batch element (for K / V)
    mask_ref : (TQ, L)  int8 mask rows for this query tile (0 = masked)
    wq/wk/wv : (E, E)   block-diagonal per-head projection weights (already W^T)
    wo_ref   : (E, E)   output projection W^T;  bo_ref: (1, E)
    o_ref    : (TQ, E)
    """
    scale = jnp.float32(1.0 / math.sqrt(embed_size))
    # masked_fill(-1e20) happens BEFORE the /sqrt(E) in the reference; the scale
    # is folded into q here, so use the equivalently scaled fill value.
    fill = jnp.float32(-1e20 / math.sqrt(embed_size))

    L = x_ref.shape[0]
    q_start = pl.multiple_of(pl.program_id(1) * tq, tq)

    x_full = x_ref[...]                          # (L, E)
    x_q = x_ref[pl.ds(q_start, tq), :]           # (TQ, E) -- sublane-aligned row slice

    # Lane-dense fused projections: one (len,E)@(E,E) per projection instead of
    # 8 tiny (len,32)@(32,32) dots.  Scale folded into q.
    q = jnp.dot(x_q, wq_ref[...], preferred_element_type=jnp.float32) * scale
    k = jnp.dot(x_full, wk_ref[...], preferred_element_type=jnp.float32)
    v = jnp.dot(x_full, wv_ref[...], preferred_element_type=jnp.float32)

    # Split heads -> (H, len, D); batched matmuls, contraction on the last dim
    # (no explicit k.T through the XLU).
    q3 = jnp.transpose(q.reshape(tq, heads, head_dim), (1, 0, 2))   # (H, TQ, D)
    k3 = jnp.transpose(k.reshape(L, heads, head_dim), (1, 0, 2))    # (H, L,  D)
    v3 = jnp.transpose(v.reshape(L, heads, head_dim), (1, 0, 2))    # (H, L,  D)

    energy = jnp.einsum('hqd,hkd->hqk', q3, k3,
                        preferred_element_type=jnp.float32)         # (H, TQ, L)

    # Mask compare done once on the (TQ, L) int8 tile, broadcast over heads.
    visible = mask_ref[...] != 0                                    # (TQ, L) bool
    energy = jnp.where(visible[None, :, :], energy, fill)

    # Numerically stable softmax over keys; reciprocal on the EUP slot.
    energy = energy - jnp.max(energy, axis=-1, keepdims=True)
    p = jnp.exp(energy)
    attn = p * pl.reciprocal(jnp.sum(p, axis=-1, keepdims=True), approx=True)

    ctx = jnp.einsum('hqk,hkd->hqd', attn, v3,
                     preferred_element_type=jnp.float32)            # (H, TQ, D)
    ctx = jnp.transpose(ctx, (1, 0, 2)).reshape(tq, embed_size)     # (TQ, E) lane-dense

    out = jnp.dot(ctx, wo_ref[...], preferred_element_type=jnp.float32) + bo_ref[...]
    o_ref[...] = out.astype(o_ref.dtype)


def masked_self_attention(x, mask, wq_t, wk_t, wv_t, wo_t, bo):
    """x: (N, L, E) f32; mask: (N, L, L) (0 = masked).
    Per-head weights pre-transposed: wq_t/wk_t/wv_t (D, D); wo_t (E, E); bo (1, E)."""
    N, L, E = x.shape
    assert E == EMBED_SIZE
    tq = min(L, 128)
    assert L % tq == 0, "sequence length must be divisible by the query tile"
    n_qt = L // tq

    # Block-diagonal (E, E) weights: head h's (D, D) block on the diagonal, so a
    # single x @ W_bd equals the per-head x[:, hD:(h+1)D] @ W^T of the module.
    eye = jnp.eye(HEADS, dtype=x.dtype)
    wq_bd = jnp.kron(eye, wq_t)
    wk_bd = jnp.kron(eye, wk_t)
    wv_bd = jnp.kron(eye, wv_t)

    mask_i8 = (mask != 0).astype(jnp.int8)      # 4x less HBM traffic than f32 mask

    kernel = functools.partial(_mha_kernel, heads=HEADS, head_dim=HEAD_DIM,
                               embed_size=E, tq=tq)
    return pl.pallas_call(
        kernel,
        out_shape=jax.ShapeDtypeStruct((N, L, E), jnp.float32),
        grid=(N, n_qt),
        in_specs=[
            pl.BlockSpec((None, L, E), lambda b, qi: (b, 0, 0)),    # x (full seq, fetched once per batch)
            pl.BlockSpec((None, tq, L), lambda b, qi: (b, qi, 0)),  # mask rows (int8)
            pl.BlockSpec((E, E), lambda b, qi: (0, 0)),             # Wq block-diag
            pl.BlockSpec((E, E), lambda b, qi: (0, 0)),             # Wk block-diag
            pl.BlockSpec((E, E), lambda b, qi: (0, 0)),             # Wv block-diag
            pl.BlockSpec((E, E), lambda b, qi: (0, 0)),             # Wfc^T
            pl.BlockSpec((1, E), lambda b, qi: (0, 0)),             # fc bias
        ],
        out_specs=pl.BlockSpec((None, tq, E), lambda b, qi: (b, qi, 0)),
        compiler_params=pltpu.CompilerParams(
            dimension_semantics=("parallel", "parallel")),
    )(x, mask_i8, wq_bd, wk_bd, wv_bd, wo_t, bo)


def reference_forward(x, mask, wq_t, wk_t, wv_t, wo_t, bo):
    """Pure-JAX mirror of the PyTorch forward (weights already transposed)."""
    N, L, E = x.shape
    xh = x.reshape(N, L, HEADS, HEAD_DIM)
    q = xh @ wq_t
    k = xh @ wk_t
    v = xh @ wv_t
    energy = jnp.einsum('nqhd,nkhd->nhqk', q, k)
    energy = jnp.where(mask[:, None, :, :] == 0, jnp.float32(-1e20), energy)
    attn = jax.nn.softmax(energy / (E ** 0.5), axis=-1)
    out = jnp.einsum('nhql,nlhd->nqhd', attn, v).reshape(N, L, E)
    return out @ wo_t + bo


if __name__ == "__main__":
    N, L, E = 2, 8, EMBED_SIZE

    key = jax.random.PRNGKey(0)
    kx, kq, kk, kv, ko, kb = jax.random.split(key, 6)

    x = jax.random.normal(kx, (N, L, E), dtype=jnp.float32)
    # causal mask (1 = visible, 0 = masked), same for both batch rows
    mask = jnp.broadcast_to(jnp.tril(jnp.ones((L, L), jnp.float32)), (N, L, L))

    # PyTorch Linear weight shape is (out, in); store transposed (so x @ W^T).
    s = 0.05
    wq_t = s * jax.random.normal(kq, (HEAD_DIM, HEAD_DIM), jnp.float32)
    wk_t = s * jax.random.normal(kk, (HEAD_DIM, HEAD_DIM), jnp.float32)
    wv_t = s * jax.random.normal(kv, (HEAD_DIM, HEAD_DIM), jnp.float32)
    wo_t = s * jax.random.normal(ko, (E, E), jnp.float32)
    bo = s * jax.random.normal(kb, (1, E), jnp.float32)

    out = masked_self_attention(x, mask, wq_t, wk_t, wv_t, wo_t, bo)
    out = jax.block_until_ready(out)

    ref = reference_forward(x, mask, wq_t, wk_t, wv_t, wo_t, bo)
    assert out.shape == (N, L, E)
    # Tolerance relaxed vs. pure-f32 exact math: approx (EUP) reciprocal in the
    # softmax plus reassociated (block-diagonal / folded-scale) matmuls.
    assert jnp.allclose(out, ref, atol=5e-3, rtol=5e-3), "mismatch vs JAX reference"

    print("KERNEL_OK")
</pallas_src>

<mosaic_0001>
module attributes {stable_mosaic.version = 11 : i64} {
  func.func @_mha_kernel(%arg0: i32, %arg1: i32, %arg2: memref<1x8x256xf32, #tpu.memory_space<vmem>>, %arg3: memref<1x8x8xi8, #tpu.memory_space<vmem>>, %arg4: memref<256x256xf32, #tpu.memory_space<vmem>>, %arg5: memref<256x256xf32, #tpu.memory_space<vmem>>, %arg6: memref<256x256xf32, #tpu.memory_space<vmem>>, %arg7: memref<256x256xf32, #tpu.memory_space<vmem>>, %arg8: memref<1x256xf32, #tpu.memory_space<vmem>>, %arg9: memref<1x8x256xf32, #tpu.memory_space<vmem>>) attributes {dimension_semantics = [#tpu.dimension_semantics<parallel>, #tpu.dimension_semantics<parallel>], iteration_bounds = array<i64: 2, 1>, scalar_prefetch = 0 : i64, scratch_operands = 0 : i64, tpu.core_type = #tpu.core_type<tc>, window_params = [{transform_indices = @transform_0, window_bounds = array<i64: 1, 8, 256>}, {transform_indices = @transform_1, window_bounds = array<i64: 1, 8, 8>}, {pipeline_mode = #tpu.pipeline_mode<synchronous>, transform_indices = @transform_2, window_bounds = array<i64: 256, 256>}, {pipeline_mode = #tpu.pipeline_mode<synchronous>, transform_indices = @transform_3, window_bounds = array<i64: 256, 256>}, {pipeline_mode = #tpu.pipeline_mode<synchronous>, transform_indices = @transform_4, window_bounds = array<i64: 256, 256>}, {pipeline_mode = #tpu.pipeline_mode<synchronous>, transform_indices = @transform_5, window_bounds = array<i64: 256, 256>}, {pipeline_mode = #tpu.pipeline_mode<synchronous>, transform_indices = @transform_6, window_bounds = array<i64: 1, 256>}, {transform_indices = @transform_7, window_bounds = array<i64: 1, 8, 256>}]} {
    %c8_i32 = arith.constant 8 : i32
    %0 = arith.muli %arg1, %c8_i32 : i32
    %1 = tpu.assume_multiple %0, 8 : i32
    %c0 = arith.constant 0 : index
    %c0_0 = arith.constant 0 : index
    %c0_1 = arith.constant 0 : index
    %2 = vector.load %arg2[%c0, %c0_0, %c0_1] : memref<1x8x256xf32, #tpu.memory_space<vmem>>, vector<1x8x256xf32>
    %3 = vector.shape_cast %2 : vector<1x8x256xf32> to vector<8x256xf32>
    %c0_2 = arith.constant 0 : index
    %4 = arith.index_cast %1 : i32 to index
    %c0_3 = arith.constant 0 : index
    %5 = vector.load %arg2[%c0_2, %4, %c0_3] : memref<1x8x256xf32, #tpu.memory_space<vmem>>, vector<1x8x256xf32>
    %6 = vector.shape_cast %5 : vector<1x8x256xf32> to vector<8x256xf32>
    %c0_4 = arith.constant 0 : index
    %c0_5 = arith.constant 0 : index
    %7 = vector.load %arg4[%c0_4, %c0_5] : memref<256x256xf32, #tpu.memory_space<vmem>>, vector<256x256xf32>
    %cst = arith.constant dense<0.000000e+00> : vector<8x256xf32>
    %8 = tpu.matmul %6, %7, %cst {dimension_numbers = #tpu.dot_dimension_numbers<[1], [0], [0], [1], [0, 0, 1, 1], [], []>} : vector<8x256xf32>, vector<256x256xf32>, vector<8x256xf32> -> vector<8x256xf32>
    %cst_6 = arith.constant 6.250000e-02 : f32
    %9 = vector.broadcast %cst_6 : f32 to vector<8x256xf32>
    %10 = arith.mulf %8, %9 : vector<8x256xf32>
    %c0_7 = arith.constant 0 : index
    %c0_8 = arith.constant 0 : index
    %11 = vector.load %arg5[%c0_7, %c0_8] : memref<256x256xf32, #tpu.memory_space<vmem>>, vector<256x256xf32>
    %cst_9 = arith.constant dense<0.000000e+00> : vector<8x256xf32>
    %12 = tpu.matmul %3, %11, %cst_9 {dimension_numbers = #tpu.dot_dimension_numbers<[1], [0], [0], [1], [0, 0, 1, 1], [], []>} : vector<8x256xf32>, vector<256x256xf32>, vector<8x256xf32> -> vector<8x256xf32>
    %c0_10 = arith.constant 0 : index
    %c0_11 = arith.constant 0 : index
    %13 = vector.load %arg6[%c0_10, %c0_11] : memref<256x256xf32, #tpu.memory_space<vmem>>, vector<256x256xf32>
    %cst_12 = arith.constant dense<0.000000e+00> : vector<8x256xf32>
    %14 = tpu.matmul %3, %13, %cst_12 {dimension_numbers = #tpu.dot_dimension_numbers<[1], [0], [0], [1], [0, 0, 1, 1], [], []>} : vector<8x256xf32>, vector<256x256xf32>, vector<8x256xf32> -> vector<8x256xf32>
    %15 = vector.shape_cast %10 : vector<8x256xf32> to vector<8x8x32xf32>
    %16 = tpu.transpose %15, [1, 0, 2] : vector<8x8x32xf32> -> vector<8x8x32xf32>
    %17 = vector.shape_cast %12 : vector<8x256xf32> to vector<8x8x32xf32>
    %18 = tpu.transpose %17, [1, 0, 2] : vector<8x8x32xf32> -> vector<8x8x32xf32>
    %19 = vector.shape_cast %14 : vector<8x256xf32> to vector<8x8x32xf32>
    %20 = tpu.transpose %19, [1, 0, 2] : vector<8x8x32xf32> -> vector<8x8x32xf32>
    "tpu.trace_start"() <{level = 10 : i32, message = "hqd,hkd->hqk"}> : () -> ()
    %cst_13 = arith.constant dense<0.000000e+00> : vector<8x8x8xf32>
    %21 = tpu.matmul %16, %18, %cst_13 {dimension_numbers = #tpu.dot_dimension_numbers<[2], [2], [1], [1], [0, 0, 0, 1, 1, 1], [0], [0]>} : vector<8x8x32xf32>, vector<8x8x32xf32>, vector<8x8x8xf32> -> vector<8x8x8xf32>
    "tpu.trace_stop"() : () -> ()
    %c0_14 = arith.constant 0 : index
    %c0_15 = arith.constant 0 : index
    %c0_16 = arith.constant 0 : index
    %22 = vector.load %arg3[%c0_14, %c0_15, %c0_16] : memref<1x8x8xi8, #tpu.memory_space<vmem>>, vector<1x8x8xi8>
    %23 = vector.shape_cast %22 : vector<1x8x8xi8> to vector<8x8xi8>
    %c0_i8 = arith.constant 0 : i8
    %24 = vector.broadcast %c0_i8 : i8 to vector<8x8xi8>
    %25 = arith.cmpi ne, %23, %24 : vector<8x8xi8>
    %26 = vector.shape_cast %25 : vector<8x8xi1> to vector<1x8x8xi1>
    %cst_17 = arith.constant -6.250000e+18 : f32
    %27 = vector.shape_cast %26 : vector<1x8x8xi1> to vector<1x8x8xi1>
    %28 = vector.broadcast %27 : vector<1x8x8xi1> to vector<8x8x8xi1>
    %29 = vector.broadcast %cst_17 : f32 to vector<8x8x8xf32>
    %30 = arith.select %28, %21, %29 : vector<8x8x8xi1>, vector<8x8x8xf32>
    %cst_18 = arith.constant dense<0xFF800000> : vector<8x8xf32>
    %31 = vector.multi_reduction <maximumf>, %30, %cst_18 [2] : vector<8x8x8xf32> to vector<8x8xf32>
    %32 = vector.shape_cast %31 : vector<8x8xf32> to vector<8x8x1xf32>
    %33 = vector.broadcast %32 : vector<8x8x1xf32> to vector<8x8x8xf32>
    %34 = arith.subf %30, %33 : vector<8x8x8xf32>
    %35 = math.exp %34 : vector<8x8x8xf32>
    %cst_19 = arith.constant dense<0.000000e+00> : vector<8x8xf32>
    %36 = vector.multi_reduction <add>, %35, %cst_19 [2] : vector<8x8x8xf32> to vector<8x8xf32>
    %37 = vector.shape_cast %36 : vector<8x8xf32> to vector<8x8x1xf32>
    %38 = tpu.reciprocal %37 {approx = true} : vector<8x8x1xf32> -> vector<8x8x1xf32>
    %39 = vector.broadcast %38 : vector<8x8x1xf32> to vector<8x8x8xf32>
    %40 = arith.mulf %35, %39 : vector<8x8x8xf32>
    "tpu.trace_start"() <{level = 10 : i32, message = "hqk,hkd->hqd"}> : () -> ()
    %cst_20 = arith.constant dense<0.000000e+00> : vector<8x8x32xf32>
    %41 = tpu.matmul %40, %20, %cst_20 {dimension_numbers = #tpu.dot_dimension_numbers<[2], [1], [1], [2], [0, 0, 0, 1, 1, 2], [0], [0]>} : vector<8x8x8xf32>, vector<8x8x32xf32>, vector<8x8x32xf32> -> vector<8x8x32xf32>
    "tpu.trace_stop"() : () -> ()
    %42 = tpu.transpose %41, [1, 0, 2] : vector<8x8x32xf32> -> vector<8x8x32xf32>
    %43 = vector.shape_cast %42 : vector<8x8x32xf32> to vector<8x256xf32>
    %c0_21 = arith.constant 0 : index
    %c0_22 = arith.constant 0 : index
    %44 = vector.load %arg7[%c0_21, %c0_22] : memref<256x256xf32, #tpu.memory_space<vmem>>, vector<256x256xf32>
    %cst_23 = arith.constant dense<0.000000e+00> : vector<8x256xf32>
    %45 = tpu.matmul %43, %44, %cst_23 {dimension_numbers = #tpu.dot_dimension_numbers<[1], [0], [0], [1], [0, 0, 1, 1], [], []>} : vector<8x256xf32>, vector<256x256xf32>, vector<8x256xf32> -> vector<8x256xf32>
    %c0_24 = arith.constant 0 : index
    %c0_25 = arith.constant 0 : index
    %46 = vector.load %arg8[%c0_24, %c0_25] : memref<1x256xf32, #tpu.memory_space<vmem>>, vector<1x256xf32>
    %47 = vector.broadcast %46 : vector<1x256xf32> to vector<8x256xf32>
    %48 = arith.addf %45, %47 : vector<8x256xf32>
    %c0_26 = arith.constant 0 : index
    %c0_27 = arith.constant 0 : index
    %c0_28 = arith.constant 0 : index
    %49 = vector.load %arg9[%c0_26, %c0_27, %c0_28] : memref<1x8x256xf32, #tpu.memory_space<vmem>>, vector<1x8x256xf32>
    %50 = vector.shape_cast %49 : vector<1x8x256xf32> to vector<8x256xf32>
    %51 = vector.shape_cast %48 : vector<8x256xf32> to vector<1x8x256xf32>
    tpu.vector_store %arg9[%c0_26, %c0_27, %c0_28], %51 {strides = array<i32>} : memref<1x8x256xf32, #tpu.memory_space<vmem>>, vector<1x8x256xf32>,
    return
  }
  func.func @transform_0(%arg0: i32, %arg1: i32) -> (i32, i32, i32) {
    %c0_i32 = arith.constant 0 : i32
    %c0_i32_0 = arith.constant 0 : i32
    %c0_i32_1 = arith.constant 0 : i32
    return %arg0, %c0_i32, %c0_i32_0 : i32, i32, i32
  }
  func.func @transform_1(%arg0: i32, %arg1: i32) -> (i32, i32, i32) {
    %c0_i32 = arith.constant 0 : i32
    %c0_i32_0 = arith.constant 0 : i32
    return %arg0, %arg1, %c0_i32 : i32, i32, i32
  }
  func.func @transform_2(%arg0: i32, %arg1: i32) -> (i32, i32) {
    %c0_i32 = arith.constant 0 : i32
    %c0_i32_0 = arith.constant 0 : i32
    %c0_i32_1 = arith.constant 0 : i32
    return %c0_i32, %c0_i32_0 : i32, i32
  }
  func.func @transform_3(%arg0: i32, %arg1: i32) -> (i32, i32) {
    %c0_i32 = arith.constant 0 : i32
    %c0_i32_0 = arith.constant 0 : i32
    %c0_i32_1 = arith.constant 0 : i32
    return %c0_i32, %c0_i32_0 : i32, i32
  }
  func.func @transform_4(%arg0: i32, %arg1: i32) -> (i32, i32) {
    %c0_i32 = arith.constant 0 : i32
    %c0_i32_0 = arith.constant 0 : i32
    %c0_i32_1 = arith.constant 0 : i32
    return %c0_i32, %c0_i32_0 : i32, i32
  }
  func.func @transform_5(%arg0: i32, %arg1: i32) -> (i32, i32) {
    %c0_i32 = arith.constant 0 : i32
    %c0_i32_0 = arith.constant 0 : i32
    %c0_i32_1 = arith.constant 0 : i32
    return %c0_i32, %c0_i32_0 : i32, i32
  }
  func.func @transform_6(%arg0: i32, %arg1: i32) -> (i32, i32) {
    %c0_i32 = arith.constant 0 : i32
    %c0_i32_0 = arith.constant 0 : i32
    %c0_i32_1 = arith.constant 0 : i32
    return %c0_i32, %c0_i32_0 : i32, i32
  }
  func.func @transform_7(%arg0: i32, %arg1: i32) -> (i32, i32, i32) {
    %c0_i32 = arith.constant 0 : i32
    %c0_i32_0 = arith.constant 0 : i32
    return %arg0, %arg1, %c0_i32 : i32, i32, i32
  }
}

</mosaic_0001>

<bundles_post_ra>
// kernel: tpu_custom_call.1
= control target key start
LH: loop header
LB: loop body
LE: loop exit
PB: predicated region body
PF: predicated region fallthrough
CT: control target
= control target key end

     0   :  { %s4936_s0 = inlined_call_operand.hbm [shape: f32[2,8,256], index: 0, kind: input, shape index: {}]   ;;  %s4937_s1 = inlined_call_operand.hbm [shape: s8[2,8,8], index: 1, kind: input, shape index: {}]   ;;  %s4938_s2 = inlined_call_operand.hbm [shape: f32[256,256], index: 2, kind: input, shape index: {}]   ;;  %s4939_s3 = inlined_call_operand.hbm [shape: f32[256,256], index: 3, kind: input, shape index: {}]   ;;  %s4940_s4 = inlined_call_operand.hbm [shape: f32[256,256], index: 4, kind: input, shape index: {}]   ;;  %s4941_s5 = inlined_call_operand.hbm [shape: f32[256,256], index: 5, kind: input, shape index: {}]   ;;  %s4942_s6 = inlined_call_operand.vmem [shape: f32[1,256], index: 6, kind: input, shape index: {}]   ;;  %s4943_s7 = inlined_call_operand.hbm [shape: f32[2,8,256], index: 7, kind: output, shape index: {}]  }
   0x1   :  { %4945 = sst [smem:[#allocation22_spill]] %s4936_s0 }
   0x2   :  { %4946 = sst [smem:[#allocation23_spill]] %s4938_s2 }
   0x3   :  { %4947 = sst [smem:[#allocation24_spill]] %s4939_s3 }
   0x4   :  { %4948 = sst [smem:[#allocation25_spill]] %s4940_s4 }
   0x5   :  { %4949 = sst [smem:[#allocation26_spill]] %s4941_s5 }
   0x6   :  { %12 = vsyncpa [#allocation3], 0 }
   0x7   :  { %14 = vsyncpa [#allocation3 + $0x1], 0 }
   0x8   :  { %15 = vsyncpa [#allocation6], 0 }
   0x9   :  { %17 = vsyncpa [#allocation6 + $0x1], 0 }
   0xa   :  { %18 = vsyncpa [#allocation9], 0 }
   0xb   :  { %19 = vsyncpa [#allocation12], 0 }
   0xc   :  { %20 = vsyncpa [#allocation4], 0 }
   0xd   :  { %22 = vsyncpa [#allocation4 + $0x1], 0  ;;  %s4290_s24 = smov 0   ;;  %s4292_s25 = smov 0  }
   0xe   :  { %s4294_s26 = smov 0   ;;  %s4296_s27 = smov 0  }
   0xf   :  { %s4298_s28 = smov 0   ;;  %s4300_s29 = smov 0  }
  0x10 LB: > { %s4321_s30 = sadd.s32 4294967295, %s4231_s29   ;;  %p3616_p0 = scmp.ge.s32.totalorder %s4231_s29, 1  ;;  %s4231_s29 = sphi %s4300_s29, %s28_s29   ;;  %s4227_s28 = sphi %s4298_s28, %s4973_s28   ;;  %s4223_s27 = sphi %s4296_s27, %s4972_s27   ;;  %s4219_s26 = sphi %s4294_s26, %s4971_s26   ;;  %s4215_s25 = sphi %s4292_s25, %s4970_s25   ;;  %s4211_s24 = sphi %s4290_s24, %s4969_s24  }
  0x11   : > { %p61_p1 = scmp.eq.s32.totalorder %s4321_s30, 0  ;;  %p232_p2 = scmp.lt.s32.totalorder %s4231_s29, 3 }
  0x12   : > { %s4233_s9 = smov [#allocation7]   ;;  %s4234_s12 = smov [#allocation8]  }
  0x13   : > { %p4326_p3 = pnand %p3616_p0, %p232_p2  ;;  %s244_s10 = sshll.u32 %s4233_s9, 4  ;;  %s245_s10 = int_to_ptr.vmem [resolvable:$true] %s244_s10 }
  0x14   : > { %s257_s13 = sshll.u32 %s4234_s12, 4  ;;  %s4235_s14 = smov [#allocation10]   ;;  %s258_s13 = int_to_ptr.vmem [resolvable:$true] %s257_s13 }
  0x15   : > { %p3832_p4 = pneg %p4326_p3  ;;  %s270_s15 = sshll.u32 %s4235_s14, 4  ;;  %s271_s15 = int_to_ptr.vmem [resolvable:$true] %s270_s15 }
  0x16   : > { %s3986_s16 = scalar_lea.vmem %s245_s10, 8192  ;;  %p3994_p11 = scmp.lt.s32.totalorder %s245_s10, %s245_s10 }
  0x17   : > { %p4335_p6 = pnand %p3832_p4, %p61_p1  ;;  %p3987_p8 = scmp.ne.s32.totalorder %s245_s10, %s3986_s16 }
  0x18   : > { %p3995_p12 = scmp.lt.s32.totalorder %s3986_s16, %s3986_s16 }
  0x19   : > { %p3977_p7 = pneg %p4335_p6 }
  0x1a   : > { %p3996_p13 = por %p3995_p12, %p3994_p11 }
  0x1b   : > { %p3989_p9 = pnand %p3987_p8, %p3977_p7 }
  0x1d   : > { %p3990_p10 = pneg %p3989_p9 }
  0x1f   : > { %p3997_p0 = pnand %p3996_p13, %p3990_p10 }
  0x21   : > { %4000 = shalt.err (!%p3997_p0)
}
  0x22   : > { %s4236_s17 = smov 256   ;;  %s4237_s18 = smov 16  }
  0x23   : > { %s4952_s2 = sld [smem:[#allocation23_spill]]  ;;  %s4012_s21 = scalar_lea.vmem %s258_s13, 8192 }
  0x24   : > { %p4013_p2 = scmp.ne.s32.totalorder %s258_s13, %s4012_s21  ;;  %p4020_p9 = scmp.lt.s32.totalorder %s258_s13, %s258_s13 }
  0x25   : > { %p4021_p10 = scmp.lt.s32.totalorder %s4012_s21, %s4012_s21 }
  0x26   : > { %p4015_p4 = pnand %p4013_p2, %p3977_p7 }
  0x27   : > { %p4022_p11 = por %p4021_p10, %p4020_p9 }
  0x28   : > { %p4016_p8 = pneg %p4015_p4 }
  0x29   : > { %3835 = dma.hbm_to_vmem [thread:$0]  (!%p4335_p6), %s4952_s2, 8192, %s245_s10, [#allocation6], %s4236_s17, %s4236_s17, %s4237_s18  }
  0x2a   : > { %p4023_p12 = pnand %p4022_p11, %p4016_p8 }
  0x2c   : > { %4026 = shalt.err (!%p4023_p12)
}
  0x2d   : > { %s4953_s3 = sld [smem:[#allocation24_spill]]  ;;  %s4038_s9 = scalar_lea.vmem %s271_s15, 8192 }
  0x2e   : > { %p4039_p13 = scmp.ne.s32.totalorder %s271_s15, %s4038_s9  ;;  %p4046_p4 = scmp.lt.s32.totalorder %s271_s15, %s271_s15 }
  0x2f   : > { %p4047_p8 = scmp.lt.s32.totalorder %s4038_s9, %s4038_s9 }
  0x30   : > { %p4041_p0 = pnand %p4039_p13, %p3977_p7 }
  0x31   : > { %p4048_p9 = por %p4047_p8, %p4046_p4 }
  0x32   : > { %p4042_p2 = pneg %p4041_p0 }
  0x33   : > { %3838 = dma.hbm_to_vmem [thread:$0]  (!%p4335_p6), %s4953_s3, 8192, %s258_s13, [#allocation9], %s4236_s17, %s4236_s17, %s4237_s18  }
  0x34   : > { %p4049_p10 = pnand %p4048_p9, %p4042_p2 }
  0x36   : > { %4052 = shalt.err (!%p4049_p10)
}
  0x37   : > { %s4954_s4 = sld [smem:[#allocation25_spill]]  ;;  %s4238_s13 = smov [#allocation11]  }
  0x38   : > { %s283_s14 = sshll.u32 %s4238_s13, 4  ;;  %s284_s14 = int_to_ptr.vmem [resolvable:$true] %s283_s14 }
  0x39   : > { %s4064_s16 = scalar_lea.vmem %s284_s14, 8192  ;;  %p4072_p0 = scmp.lt.s32.totalorder %s284_s14, %s284_s14 }
  0x3a   : > { %p4065_p11 = scmp.ne.s32.totalorder %s284_s14, %s4064_s16  ;;  %p4073_p2 = scmp.lt.s32.totalorder %s4064_s16, %s4064_s16 }
  0x3c   : > { %p4067_p12 = pnand %p4065_p11, %p3977_p7  ;;  %p4074_p4 = por %p4073_p2, %p4072_p0 }
  0x3d   : > { %3841 = dma.hbm_to_vmem [thread:$0]  (!%p4335_p6), %s4954_s4, 8192, %s271_s15, [#allocation9], %s4236_s17, %s4236_s17, %s4237_s18  }
  0x3e   : > { %p4068_p13 = pneg %p4067_p12 }
  0x40   : > { %p4075_p8 = pnand %p4074_p4, %p4068_p13 }
  0x42   : > { %4078 = shalt.err (!%p4075_p8)
}
  0x43   : > { %s4955_s5 = sld [smem:[#allocation26_spill]]  ;;  %s3615_s11 = sadd.s32 4294967294, %s4231_s29  }
  0x44   : > { %s40_s20 = sadd.s32 1, %s4227_s28  ;;  %s47_s21 = sadd.s32 1, %s4219_s26 }
  0x45   : > { %p42_p7 = scmp.ge.s32.totalorder %s40_s20, 2  ;;  %p54_p9 = scmp.ne.s32.totalorder %s4219_s26, %s4215_s25 }
  0x46   : > { %p55_p10 = scmp.eq.s32.totalorder %s4231_s29, 0  ;;  %p60_p12 = scmp.ne.s32.totalorder %s4215_s25, %s4211_s24 }
  0x47   : > { %s4975_s20 = smov (%p42_p7, %s40_s20), 0  ;;  %p225_p4 = scmp.eq.s32.totalorder %s3615_s11, 1 }
  0x48   : > { %4956 = sst [smem:[#allocation20_spill]] %s4975_s20  ;;  %p4393_p11 = por %p55_p10, %p54_p9 }
  0x49   : > { %3844 = dma.hbm_to_vmem [thread:$0]  (!%p4335_p6), %s4955_s5, 8192, %s284_s14, [#allocation12], %s4236_s17, %s4236_s17, %s4237_s18  }
  0x4a   : > { %s44_s17 = ssub.s32 %s4227_s28, %s4975_s20  ;;  %p219_p6 = scmp.eq.s32.totalorder %s4321_s30, 1 }
  0x4b   : > { %p45_p13 = scmp.eq.s32.totalorder %s44_s17, 0  ;;  %p4404_p0 = por %p61_p1, %p60_p12 }
  0x4c   : > { %p4408_p2 = por %p219_p6, %p54_p9  ;;  %p4415_p8 = por %p225_p4, %p60_p12 }
  0x4d   : > { %s4413_s9 = scalar_select %p45_p13, %s4219_s26, %s47_s21  }
  0x4e   : > { %p3860_p7 = scmp.lt.s32.totalorder %s4231_s29, 2  ;;  %s300_s12 = sand.u32 1, %s4219_s26  }
  0x4f   : > { %4960 = sst [smem:[#allocation21_spill]] %s4413_s9  ;;  %s3696_s13 = sshll.u32 %s4227_s28, 8 }
  0x50   : > { %s3622_s14 = sshll.u32 %s300_s12, 4  ;;  %s4962_s0 = sld [smem:[#allocation22_spill]] }
  0x51   : > { %s304_s17 = scalar_lea.vmem [#allocation2], %s3622_s14  ;;  %p4427_p9 = pnand %p3860_p7, %p4393_p11 }
  0x52   : > { %s312_s2 = sshll.u32 %s304_s17, 4  ;;  %s319_s11 = sand.u32 1, %s4231_s29   ;;  %s313_s2 = int_to_ptr.vmem [resolvable:$true] %s312_s2 }
  0x53   : > { %s301_s21 = scalar_lea.sflag [#allocation3], %s300_s12  ;;  %p4081_p10 = pneg %p4427_p9 }
  0x54   : > { %s4092_s4 = scalar_lea.vmem %s313_s2, 256 }
  0x55   : > { %p4093_p12 = scmp.ne.s32.totalorder %s313_s2, %s4092_s4 }
  0x56   : > { %s310_s19 = scalar_lea.hbm %s4962_s0, %s3696_s13  ;;  %s4239_s13 = smov [#allocation2]  }
  0x57   : > { %p4095_p6 = pnand %p4093_p12, %p4081_p10  ;;  %s4097_s14 = sshll.u32 %s4239_s13, 4  ;;  %s4098_s14 = int_to_ptr.vmem [resolvable:$false] %s4097_s14 }
  0x58   : > { %s4099_s22 = scalar_lea.vmem %s4098_s14, 512  ;;  %p4100_p11 = scmp.lt.s32.totalorder %s313_s2, %s4098_s14 }
  0x59   : > { %p4096_p13 = pneg %p4095_p6  ;;  %p4101_p4 = scmp.lt.s32.totalorder %s4099_s22, %s4092_s4 }
  0x5b   : > { %p4102_p7 = por %p4101_p4, %p4100_p11 }
  0x5d   : > { %p4103_p5 = pnand %p4102_p7, %p4096_p13 }
  0x5f   : > { %4106 = shalt.err (!%p4103_p5)
}
  0x60   : > { %3848 = dma.hbm_to_vmem [thread:$0]  (!%p4427_p9), %s310_s19, 256, %s313_s2, %s301_s21  }
  0x61   : > { %s3625_s16 = sshll.u32 %s300_s12, 1  ;;  %s3626_s15 = sshll.u32 %s4227_s28, 5 }
  0x62   : > { %s329_s5 = scalar_lea.hbm %s4937_s1, %s3626_s15  ;;  %s323_s20 = scalar_lea.vmem [#allocation5], %s3625_s16 }
  0x63   : > { %s331_s13 = sshll.u32 %s323_s20, 4  ;;  %s320_s9 = scalar_lea.sflag [#allocation6], %s319_s11  ;;  %s332_s13 = int_to_ptr.vmem [resolvable:$true] %s331_s13 }
  0x64   : > { %s4120_s14 = scalar_lea.vmem %s332_s13, 32  ;;  %s4240_s4 = smov [#allocation5]  }
  0x65   : > { %p4121_p12 = scmp.ne.s32.totalorder %s332_s13, %s4120_s14  ;;  %s4125_s22 = sshll.u32 %s4240_s4, 4  ;;  %s4126_s22 = int_to_ptr.vmem [resolvable:$false] %s4125_s22 }
  0x66   : > { %s4127_s2 = scalar_lea.vmem %s4126_s22, 64  ;;  %p4128_p13 = scmp.lt.s32.totalorder %s332_s13, %s4126_s22 }
  0x67   : > { %p4123_p5 = pnand %p4121_p12, %p4081_p10  ;;  %p4129_p11 = scmp.lt.s32.totalorder %s4127_s2, %s4120_s14 }
  0x69   : > { %p4124_p6 = pneg %p4123_p5  ;;  %p4130_p4 = por %p4129_p11, %p4128_p13 }
  0x6b   : > { %p4131_p7 = pnand %p4130_p4, %p4124_p6 }
  0x6d   : > { %4134 = shalt.err (!%p4131_p7)
}
  0x6e   : > { %3851 = dma.hbm_to_vmem [thread:$0]  (!%p4427_p9), %s329_s5, 32, %s332_s13, %s320_s9  }
  0x6f   : > { %340 = sbr.rel (%p4326_p3) target bundleno = 1660 (0x67c), region = 48  ;;  %s4451_s0 = sand.u32 (!%p4326_p3), 1, %s4215_s25  }
  0x70   : > { %s3628_s20 = sshll.u32 (!%p4326_p3), %s4451_s0, 4  ;;  %s343_s12 = scalar_lea.sflag (!%p4326_p3), [#allocation3], %s4451_s0 }
  0x71   : > { %s4457_s19 = scalar_lea.vmem (!%p4326_p3), [#allocation2], %s3628_s20 }
  0x74   : > { %4186 = dma.done.wait (%p4404_p0), %s343_s12, 256  }
  0x75   : > { %4188 = vsyncadd (%p4404_p0), %s343_s12, 4294967040  ;;  %s351_s3 = sand.u32 1, %s4321_s30   ;;  %s3629_s5 = sshll.u32 %s4451_s0, 1 }
  0x76   : > { %s352_s8 = scalar_lea.sflag [#allocation6], %s351_s3  ;;  %s4465_s9 = scalar_lea.vmem [#allocation5], %s3629_s5 }
  0x77   : > { %4190 = dma.done.wait (%p4404_p0), %s352_s8, 32  }
  0x78   : > { %4192 = vsyncadd (%p4404_p0), %s352_s8, 4294967264 }
  0x79   : > { %4194 = dma.done.wait (%p61_p1), [#allocation6], 8192  }
  0x7a   : > { %4196 = vsyncadd (%p61_p1), [#allocation6], 4294959104 }
  0x7b   : > { %4198 = dma.done.wait (%p61_p1), [#allocation9], 16384  }
  0x7c   : > { %4200 = vsyncadd (%p61_p1), [#allocation9], 4294950912 }
  0x7d   : > { %4202 = dma.done.wait (%p61_p1), [#allocation12], 8192  }
  0x7e   : > { %4204 = vsyncadd (%p61_p1), [#allocation12], 4294959104  ;;  %v450_v0 = vld [vmem:[#allocation7 + $0xf8] sm:$0xff]  ;;  %v449_v2 = vld [vmem:[#allocation7 + $0xf0] sm:$0xff]  ;;  %s4241_s30 = smov 32   ;;  %s4242_s18 = smov 96  }
  0x7f   : > { %v587_v1 = vld [vmem:[#allocation8 + $0xf8] sm:$0xff]  ;;  %483 = vmatprep.subr.mxu0 %v450_v0  ;;  %v586_v3 = vld [vmem:[#allocation8 + $0xf0] sm:$0xff]  ;;  %v448_v4 = vld [vmem:[#allocation7 + $0xe8] sm:$0xff]  ;;  %s4243_s11 = smov 64   ;;  %vm4245_vm0 = vmmov 0   ;;  %vm1702_vm1 = vcmask 261120  }
  0x80   : > { %620 = vmatprep.subr.mxu1 %v587_v1  ;;  %v585_v5 = vld [vmem:[#allocation8 + $0xe8] sm:$0xff]  ;;  %484 = vmatpush1.msra.mxu0 %v449_v2  ;;  %v447_v6 = vld [vmem:[#allocation7 + $0xe0] sm:$0xff]  ;;  %v446_v8 = vld [vmem:[#allocation7 + $0xd8] sm:$0xff]  ;;  %vm2326_vm4 = vcmask 64512   ;;  %vm3296_vm5 = vcmask 523264   ;;  %vm3298_vm6 = vcmask 785408  }
  0x81   : > { %621 = vmatpush1.msra.mxu1 %v586_v3  ;;  %v584_v7 = vld [vmem:[#allocation8 + $0xe0] sm:$0xff]  ;;  %485 = vmatprep.subr.mxu0 %v448_v4  ;;  %v583_v9 = vld [vmem:[#allocation8 + $0xd8] sm:$0xff]  ;;  %v445_v10 = vld [vmem:[#allocation7 + $0xd0] sm:$0xff]  ;;  %s3697_s15 = sshll.u32 %s4223_s27, 8  ;;  %s406_s17 = scalar_lea.vmem [#allocation13], %s3628_s20 }
  0x82   : > { %622 = vmatprep.subr.mxu1 %v585_v5  ;;  %v582_v11 = vld [vmem:[#allocation8 + $0xd0] sm:$0xff]  ;;  %486 = vmatpush1.msra.mxu0 %v447_v6  ;;  %v444_v12 = vld [vmem:[#allocation7 + $0xc8] sm:$0xff]  ;;  %v443_v14 = vld [vmem:[#allocation7 + $0xc0] sm:$0xff]  ;;  %s3469_s13 = sshll.u32 %s406_s17, 4  ;;  %s3467_s22 = scalar_lea.hbm %s4943_s7, %s3697_s15  ;;  %s3470_s13 = int_to_ptr.vmem [resolvable:$true] %s3469_s13 }
  0x83   : > { %623 = vmatpush1.msra.mxu1 %v584_v7  ;;  %v581_v13 = vld [vmem:[#allocation8 + $0xc8] sm:$0xff]  ;;  %487 = vmatprep.subr.mxu0 %v446_v8  ;;  %v580_v15 = vld [vmem:[#allocation8 + $0xc0] sm:$0xff]  ;;  %v442_v16 = vld [vmem:[#allocation7 + $0xb8] sm:$0xff]  ;;  %s3453_s2 = scalar_lea.sflag [#allocation4], %s4451_s0  ;;  %s4135_s12 = scalar_lea.vmem %s3470_s13, 256 }
  0x84   : > { %624 = vmatprep.subr.mxu1 %v583_v9  ;;  %488 = vmatpush1.msra.mxu0 %v445_v10  ;;  %v579_v17 = vld [vmem:[#allocation8 + $0xb8] sm:$0xff]  ;;  %v441_v18 = vld [vmem:[#allocation7 + $0xb0] sm:$0xff]  ;;  %v440_v20 = vld [vmem:[#allocation7 + $0xa8] sm:$0xff]  ;;  %p4136_p1 = scmp.ne.s32.totalorder %s3470_s13, %s4135_s12  ;;  %s4249_s27 = smov [#allocation13]  }
  0x85   : > { %625 = vmatpush1.msra.mxu1 %v582_v11  ;;  %489 = vmatprep.subr.mxu0 %v444_v12  ;;  %v578_v19 = vld [vmem:[#allocation8 + $0xb0] sm:$0xff]  ;;  %v577_v21 = vld [vmem:[#allocation8 + $0xa8] sm:$0xff]  ;;  %v439_v22 = vld [vmem:[#allocation7 + $0xa0] sm:$0xff] }
  0x86   : > { %626 = vmatprep.subr.mxu1 %v581_v13  ;;  %490 = vmatpush1.msra.mxu0 %v443_v14  ;;  %v576_v23 = vld [vmem:[#allocation8 + $0xa0] sm:$0xff]  ;;  %v438_v24 = vld [vmem:[#allocation7 + $0x98] sm:$0xff]  ;;  %v437_v26 = vld [vmem:[#allocation7 + $0x90] sm:$0xff]  ;;  %p4137_p3 = pnand %p4136_p1, %p4408_p2 }
  0x87   : > { %627 = vmatpush1.msra.mxu1 %v580_v15  ;;  %491 = vmatprep.subr.mxu0 %v442_v16  ;;  %v575_v25 = vld [vmem:[#allocation8 + $0x98] sm:$0xff]  ;;  %v574_v27 = vld [vmem:[#allocation8 + $0x90] sm:$0xff]  ;;  %v436_v28 = vld [vmem:[#allocation7 + $0x88] sm:$0xff] }
  0x88   : > { %628 = vmatprep.subr.mxu1 %v579_v17  ;;  %492 = vmatpush1.msra.mxu0 %v441_v18  ;;  %v573_v29 = vld [vmem:[#allocation8 + $0x88] sm:$0xff]  ;;  %v435_v30 = vld [vmem:[#allocation7 + $0x80] sm:$0xff]  ;;  %v434_v32 = vld [vmem:[#allocation7 + $0x78] sm:$0xff]  ;;  %p4138_p0 = pneg %p4137_p3 }
  0x89   : > { %629 = vmatpush1.msra.mxu1 %v578_v19  ;;  %493 = vmatprep.subr.mxu0 %v440_v20  ;;  %v572_v31 = vld [vmem:[#allocation8 + $0x80] sm:$0xff]  ;;  %v571_v33 = vld [vmem:[#allocation8 + $0x78] sm:$0xff]  ;;  %v433_v34 = vld [vmem:[#allocation7 + $0x70] sm:$0xff] }
  0x8a   : > { %630 = vmatprep.subr.mxu1 %v577_v21  ;;  %494 = vmatpush1.msra.mxu0 %v439_v22  ;;  %v570_v35 = vld [vmem:[#allocation8 + $0x70] sm:$0xff]  ;;  %v432_v36 = vld [vmem:[#allocation7 + $0x68] sm:$0xff]  ;;  %v431_v38 = vld [vmem:[#allocation7 + $0x60] sm:$0xff] }
  0x8b   : > { %631 = vmatpush1.msra.mxu1 %v576_v23  ;;  %495 = vmatprep.subr.mxu0 %v438_v24  ;;  %v569_v37 = vld [vmem:[#allocation8 + $0x68] sm:$0xff]  ;;  %v568_v39 = vld [vmem:[#allocation8 + $0x60] sm:$0xff]  ;;  %v430_v40 = vld [vmem:[#allocation7 + $0x58] sm:$0xff] }
  0x8c   : > { %632 = vmatprep.subr.mxu1 %v575_v25  ;;  %496 = vmatpush1.msra.mxu0 %v437_v26  ;;  %v567_v41 = vld [vmem:[#allocation8 + $0x58] sm:$0xff]  ;;  %v429_v42 = vld [vmem:[#allocation7 + $0x50] sm:$0xff]  ;;  %v428_v44 = vld [vmem:[#allocation7 + $0x48] sm:$0xff] }
  0x8d   : > { %633 = vmatpush1.msra.mxu1 %v574_v27  ;;  %497 = vmatprep.subr.mxu0 %v436_v28  ;;  %v566_v43 = vld [vmem:[#allocation8 + $0x50] sm:$0xff]  ;;  %v565_v45 = vld [vmem:[#allocation8 + $0x48] sm:$0xff]  ;;  %v427_v46 = vld [vmem:[#allocation7 + $0x40] sm:$0xff] }
  0x8e   : > { %634 = vmatprep.subr.mxu1 %v573_v29  ;;  %498 = vmatpush1.msra.mxu0 %v435_v30  ;;  %v564_v47 = vld [vmem:[#allocation8 + $0x40] sm:$0xff]  ;;  %v426_v48 = vld [vmem:[#allocation7 + $0x38] sm:$0xff]  ;;  %v425_v50 = vld [vmem:[#allocation7 + $0x30] sm:$0xff] }
  0x8f   : > { %635 = vmatpush1.msra.mxu1 %v572_v31  ;;  %499 = vmatprep.subr.mxu0 %v434_v32  ;;  %v563_v49 = vld [vmem:[#allocation8 + $0x38] sm:$0xff]  ;;  %v562_v51 = vld [vmem:[#allocation8 + $0x30] sm:$0xff]  ;;  %v424_v52 = vld [vmem:[#allocation7 + $0x28] sm:$0xff] }
  0x90   : > { %636 = vmatprep.subr.mxu1 %v571_v33  ;;  %500 = vmatpush1.msra.mxu0 %v433_v34  ;;  %v561_v53 = vld [vmem:[#allocation8 + $0x28] sm:$0xff]  ;;  %v423_v54 = vld [vmem:[#allocation7 + $0x20] sm:$0xff]  ;;  %v422_v56 = vld [vmem:[#allocation7 + $0x18] sm:$0xff] }
  0x91   : > { %637 = vmatpush1.msra.mxu1 %v570_v35  ;;  %501 = vmatprep.subr.mxu0 %v432_v36  ;;  %v560_v55 = vld [vmem:[#allocation8 + $0x20] sm:$0xff]  ;;  %v559_v57 = vld [vmem:[#allocation8 + $0x18] sm:$0xff]  ;;  %v421_v58 = vld [vmem:[#allocation7 + $0x10] sm:$0xff] }
  0x92   : > { %638 = vmatprep.subr.mxu1 %v569_v37  ;;  %502 = vmatpush1.msra.mxu0 %v431_v38  ;;  %v558_v59 = vld [vmem:[#allocation8 + $0x10] sm:$0xff]  ;;  %v420_v60 = vld [vmem:[#allocation7 + $0x8] sm:$0xff]  ;;  %v419_v62 = vld [vmem:[#allocation7] sm:$0xff] }
  0x93   : > { %639 = vmatpush1.msra.mxu1 %v568_v39  ;;  %503 = vmatprep.subr.mxu0 %v430_v40  ;;  %v557_v61 = vld [vmem:[#allocation8 + $0x8] sm:$0xff]  ;;  %v556_v63 = vld [vmem:[#allocation8] sm:$0xff]  ;;  %v482_v0 = vld [vmem:[#allocation7 + $0x1f8] sm:$0xff] }
  0x94   : > { %640 = vmatprep.subr.mxu1 %v567_v41  ;;  %504 = vmatpush1.msra.mxu0 %v429_v42  ;;  %v619_v1 = vld [vmem:[#allocation8 + $0x1f8] sm:$0xff]  ;;  %v481_v2 = vld [vmem:[#allocation7 + $0x1f0] sm:$0xff]  ;;  %v480_v4 = vld [vmem:[#allocation7 + $0x1e8] sm:$0xff] }
  0x95   : > { %641 = vmatpush1.msra.mxu1 %v566_v43  ;;  %505 = vmatprep.subr.mxu0 %v428_v44  ;;  %v618_v3 = vld [vmem:[#allocation8 + $0x1f0] sm:$0xff]  ;;  %v617_v5 = vld [vmem:[#allocation8 + $0x1e8] sm:$0xff]  ;;  %v479_v6 = vld [vmem:[#allocation7 + $0x1e0] sm:$0xff] }
  0x96   : > { %642 = vmatprep.subr.mxu1 %v565_v45  ;;  %506 = vmatpush1.msra.mxu0 %v427_v46  ;;  %v616_v7 = vld [vmem:[#allocation8 + $0x1e0] sm:$0xff]  ;;  %v478_v8 = vld [vmem:[#allocation7 + $0x1d8] sm:$0xff]  ;;  %v477_v10 = vld [vmem:[#allocation7 + $0x1d0] sm:$0xff] }
  0x97   : > { %643 = vmatpush1.msra.mxu1 %v564_v47  ;;  %507 = vmatprep.subr.mxu0 %v426_v48  ;;  %v615_v9 = vld [vmem:[#allocation8 + $0x1d8] sm:$0xff]  ;;  %v614_v11 = vld [vmem:[#allocation8 + $0x1d0] sm:$0xff]  ;;  %v476_v12 = vld [vmem:[#allocation7 + $0x1c8] sm:$0xff] }
  0x98   : > { %644 = vmatprep.subr.mxu1 %v563_v49  ;;  %508 = vmatpush1.msra.mxu0 %v425_v50  ;;  %v613_v13 = vld [vmem:[#allocation8 + $0x1c8] sm:$0xff]  ;;  %v475_v14 = vld [vmem:[#allocation7 + $0x1c0] sm:$0xff]  ;;  %v474_v16 = vld [vmem:[#allocation7 + $0x1b8] sm:$0xff] }
  0x99   : > { %645 = vmatpush1.msra.mxu1 %v562_v51  ;;  %509 = vmatprep.subr.mxu0 %v424_v52  ;;  %v612_v15 = vld [vmem:[#allocation8 + $0x1c0] sm:$0xff]  ;;  %v611_v17 = vld [vmem:[#allocation8 + $0x1b8] sm:$0xff]  ;;  %v473_v18 = vld [vmem:[#allocation7 + $0x1b0] sm:$0xff] }
  0x9a   : > { %646 = vmatprep.subr.mxu1 %v561_v53  ;;  %510 = vmatpush1.msra.mxu0 %v423_v54  ;;  %v610_v19 = vld [vmem:[#allocation8 + $0x1b0] sm:$0xff]  ;;  %v472_v20 = vld [vmem:[#allocation7 + $0x1a8] sm:$0xff]  ;;  %v471_v22 = vld [vmem:[#allocation7 + $0x1a0] sm:$0xff] }
  0x9b   : > { %647 = vmatpush1.msra.mxu1 %v560_v55  ;;  %511 = vmatprep.subr.mxu0 %v422_v56  ;;  %v609_v21 = vld [vmem:[#allocation8 + $0x1a8] sm:$0xff]  ;;  %v608_v23 = vld [vmem:[#allocation8 + $0x1a0] sm:$0xff]  ;;  %v470_v24 = vld [vmem:[#allocation7 + $0x198] sm:$0xff] }
  0x9c   : > { %648 = vmatprep.subr.mxu1 %v559_v57  ;;  %512 = vmatpush1.msra.mxu0 %v421_v58  ;;  %v607_v25 = vld [vmem:[#allocation8 + $0x198] sm:$0xff]  ;;  %v469_v26 = vld [vmem:[#allocation7 + $0x190] sm:$0xff]  ;;  %v468_v28 = vld [vmem:[#allocation7 + $0x188] sm:$0xff] }
  0x9d   : > { %649 = vmatpush1.msra.mxu1 %v558_v59  ;;  %513 = vmatprep.subr.mxu0 %v420_v60  ;;  %v606_v27 = vld [vmem:[#allocation8 + $0x190] sm:$0xff]  ;;  %v605_v29 = vld [vmem:[#allocation8 + $0x188] sm:$0xff]  ;;  %v467_v30 = vld [vmem:[#allocation7 + $0x180] sm:$0xff] }
  0x9e   : > { %650 = vmatprep.subr.mxu1 %v557_v61  ;;  %514 = vmatpush1.msra.mxu0 %v419_v62  ;;  %v604_v31 = vld [vmem:[#allocation8 + $0x180] sm:$0xff]  ;;  %v466_v32 = vld [vmem:[#allocation7 + $0x178] sm:$0xff]  ;;  %v465_v34 = vld [vmem:[#allocation7 + $0x170] sm:$0xff] }
  0x9f   : > { %651 = vmatpush1.msra.mxu1 %v556_v63  ;;  %515 = vmatprep.subr.mxu0 %v482_v0  ;;  %v603_v33 = vld [vmem:[#allocation8 + $0x178] sm:$0xff]  ;;  %v602_v35 = vld [vmem:[#allocation8 + $0x170] sm:$0xff]  ;;  %v464_v36 = vld [vmem:[#allocation7 + $0x168] sm:$0xff] }
  0xa0   : > { %652 = vmatprep.subr.mxu1 %v619_v1  ;;  %516 = vmatpush2.msra.mxu0 %v481_v2  ;;  %v601_v37 = vld [vmem:[#allocation8 + $0x168] sm:$0xff]  ;;  %v463_v38 = vld [vmem:[#allocation7 + $0x160] sm:$0xff]  ;;  %v462_v40 = vld [vmem:[#allocation7 + $0x158] sm:$0xff] }
  0xa1   : > { %653 = vmatpush2.msra.mxu1 %v618_v3  ;;  %517 = vmatprep.subr.mxu0 %v480_v4  ;;  %v600_v39 = vld [vmem:[#allocation8 + $0x160] sm:$0xff]  ;;  %v599_v41 = vld [vmem:[#allocation8 + $0x158] sm:$0xff]  ;;  %v461_v42 = vld [vmem:[#allocation7 + $0x150] sm:$0xff] }
  0xa2   : > { %654 = vmatprep.subr.mxu1 %v617_v5  ;;  %518 = vmatpush2.msra.mxu0 %v479_v6  ;;  %v598_v43 = vld [vmem:[#allocation8 + $0x150] sm:$0xff]  ;;  %v460_v44 = vld [vmem:[#allocation7 + $0x148] sm:$0xff]  ;;  %v459_v46 = vld [vmem:[#allocation7 + $0x140] sm:$0xff] }
  0xa3   : > { %655 = vmatpush2.msra.mxu1 %v616_v7  ;;  %519 = vmatprep.subr.mxu0 %v478_v8  ;;  %v597_v45 = vld [vmem:[#allocation8 + $0x148] sm:$0xff]  ;;  %v596_v47 = vld [vmem:[#allocation8 + $0x140] sm:$0xff]  ;;  %v458_v48 = vld [vmem:[#allocation7 + $0x138] sm:$0xff] }
  0xa4   : > { %656 = vmatprep.subr.mxu1 %v615_v9  ;;  %520 = vmatpush2.msra.mxu0 %v477_v10  ;;  %v595_v49 = vld [vmem:[#allocation8 + $0x138] sm:$0xff]  ;;  %v457_v50 = vld [vmem:[#allocation7 + $0x130] sm:$0xff]  ;;  %v456_v52 = vld [vmem:[#allocation7 + $0x128] sm:$0xff] }
  0xa5   : > { %657 = vmatpush2.msra.mxu1 %v614_v11  ;;  %521 = vmatprep.subr.mxu0 %v476_v12  ;;  %v594_v51 = vld [vmem:[#allocation8 + $0x130] sm:$0xff]  ;;  %v593_v53 = vld [vmem:[#allocation8 + $0x128] sm:$0xff]  ;;  %v455_v54 = vld [vmem:[#allocation7 + $0x120] sm:$0xff] }
  0xa6   : > { %658 = vmatprep.subr.mxu1 %v613_v13  ;;  %522 = vmatpush2.msra.mxu0 %v475_v14  ;;  %v592_v55 = vld [vmem:[#allocation8 + $0x120] sm:$0xff]  ;;  %v454_v56 = vld [vmem:[#allocation7 + $0x118] sm:$0xff]  ;;  %v453_v58 = vld [vmem:[#allocation7 + $0x110] sm:$0xff] }
  0xa7   : > { %659 = vmatpush2.msra.mxu1 %v612_v15  ;;  %523 = vmatprep.subr.mxu0 %v474_v16  ;;  %v591_v57 = vld [vmem:[#allocation8 + $0x118] sm:$0xff]  ;;  %v590_v59 = vld [vmem:[#allocation8 + $0x110] sm:$0xff]  ;;  %v452_v60 = vld [vmem:[#allocation7 + $0x108] sm:$0xff]  ;;  %v4244_v15 = vmov 0.0  }
  0xa8   : > { %660 = vmatprep.subr.mxu1 %v611_v17  ;;  %524 = vmatpush2.msra.mxu0 %v473_v18  ;;  %v589_v61 = vld [vmem:[#allocation8 + $0x108] sm:$0xff]  ;;  %v451_v62 = vld [vmem:[#allocation7 + $0x100] sm:$0xff]  ;;  %v722_v5 = vld [vmem:[#allocation10 + $0xf8] sm:$0xff] }
  0xa9   : > { %661 = vmatpush2.msra.mxu1 %v610_v19  ;;  %525 = vmatprep.subr.mxu0 %v472_v20  ;;  %v418_v63 = vld [vmem:[%s4457_s19 + $0x8] sm:$0xff]  ;;  %v4485_v1 = vld [vmem:[%s4457_s19] sm:$0xff]  ;;  %s4139_s19 = sshll.u32 %s4249_s27, 4  ;;  %s4140_s19 = int_to_ptr.vmem [resolvable:$false] %s4139_s19 }
  0xaa   : > { %662 = vmatprep.subr.mxu1 %v609_v21  ;;  %526 = vmatpush2.msra.mxu0 %v471_v22  ;;  %v588_v0 = vld [vmem:[#allocation8 + $0x100] sm:$0xff]  ;;  %v721_v6 = vld [vmem:[#allocation10 + $0xf0] sm:$0xff]  ;;  %v720_v7 = vld [vmem:[#allocation10 + $0xe8] sm:$0xff]  ;;  %s4141_s20 = scalar_lea.vmem %s4140_s19, 512  ;;  %p4142_p9 = scmp.lt.s32.totalorder %s3470_s13, %s4140_s19 }
  0xab   : > { %663 = vmatpush2.msra.mxu1 %v608_v23  ;;  %527 = vmatprep.subr.mxu0 %v470_v24  ;;  %v719_v8 = vld [vmem:[#allocation10 + $0xe0] sm:$0xff]  ;;  %v718_v11 = vld [vmem:[#allocation10 + $0xd8] sm:$0xff]  ;;  %v717_v12 = vld [vmem:[#allocation10 + $0xd0] sm:$0xff]  ;;  %p4143_p10 = scmp.lt.s32.totalorder %s4141_s20, %s4135_s12 }
  0xac   : > { %664 = vmatprep.subr.mxu1 %v607_v25  ;;  %528 = vmatpush2.msra.mxu0 %v469_v26  ;;  %v716_v14 = vld [vmem:[#allocation10 + $0xc8] sm:$0xff]  ;;  %v715_v16 = vld [vmem:[#allocation10 + $0xc0] sm:$0xff]  ;;  %v714_v17 = vld [vmem:[#allocation10 + $0xb8] sm:$0xff] }
  0xad   : > { %665 = vmatpush2.msra.mxu1 %v606_v27  ;;  %529 = vmatprep.subr.mxu0 %v468_v28  ;;  %v713_v18 = vld [vmem:[#allocation10 + $0xb0] sm:$0xff]  ;;  %v712_v19 = vld [vmem:[#allocation10 + $0xa8] sm:$0xff]  ;;  %v711_v20 = vld [vmem:[#allocation10 + $0xa0] sm:$0xff]  ;;  %p4144_p12 = por %p4143_p10, %p4142_p9 }
  0xae   : > { %666 = vmatprep.subr.mxu1 %v605_v29  ;;  %530 = vmatpush2.msra.mxu0 %v467_v30  ;;  %v710_v21 = vld [vmem:[#allocation10 + $0x98] sm:$0xff]  ;;  %v709_v22 = vld [vmem:[#allocation10 + $0x90] sm:$0xff]  ;;  %v708_v23 = vld [vmem:[#allocation10 + $0x88] sm:$0xff] }
  0xaf   : > { %667 = vmatpush2.msra.mxu1 %v604_v31  ;;  %531 = vmatprep.subr.mxu0 %v466_v32  ;;  %v707_v24 = vld [vmem:[#allocation10 + $0x80] sm:$0xff]  ;;  %v706_v25 = vld [vmem:[#allocation10 + $0x78] sm:$0xff]  ;;  %v705_v26 = vld [vmem:[#allocation10 + $0x70] sm:$0xff]  ;;  %p4145_p5 = pnand %p4144_p12, %p4138_p0 }
  0xb0   : > { %668 = vmatprep.subr.mxu1 %v603_v33  ;;  %532 = vmatpush2.msra.mxu0 %v465_v34  ;;  %v704_v27 = vld [vmem:[#allocation10 + $0x68] sm:$0xff]  ;;  %v703_v28 = vld [vmem:[#allocation10 + $0x60] sm:$0xff]  ;;  %v702_v29 = vld [vmem:[#allocation10 + $0x58] sm:$0xff] }
  0xb1   : > { %669 = vmatpush2.msra.mxu1 %v602_v35  ;;  %533 = vmatprep.subr.mxu0 %v464_v36  ;;  %v701_v30 = vld [vmem:[#allocation10 + $0x50] sm:$0xff]  ;;  %v700_v31 = vld [vmem:[#allocation10 + $0x48] sm:$0xff]  ;;  %v699_v32 = vld [vmem:[#allocation10 + $0x40] sm:$0xff] }
  0xb2   : > { %670 = vmatprep.subr.mxu1 %v601_v37  ;;  %534 = vmatpush2.msra.mxu0 %v463_v38  ;;  %v698_v33 = vld [vmem:[#allocation10 + $0x38] sm:$0xff]  ;;  %v697_v34 = vld [vmem:[#allocation10 + $0x30] sm:$0xff]  ;;  %v696_v35 = vld [vmem:[#allocation10 + $0x28] sm:$0xff] }
  0xb3   : > { %671 = vmatpush2.msra.mxu1 %v600_v39  ;;  %535 = vmatprep.subr.mxu0 %v462_v40  ;;  %v695_v36 = vld [vmem:[#allocation10 + $0x20] sm:$0xff]  ;;  %v694_v37 = vld [vmem:[#allocation10 + $0x18] sm:$0xff]  ;;  %v693_v38 = vld [vmem:[#allocation10 + $0x10] sm:$0xff] }
  0xb4   : > { %672 = vmatprep.subr.mxu1 %v599_v41  ;;  %536 = vmatpush2.msra.mxu0 %v461_v42  ;;  %v692_v39 = vld [vmem:[#allocation10 + $0x8] sm:$0xff]  ;;  %v691_v40 = vld [vmem:[#allocation10] sm:$0xff]  ;;  %v754_v41 = vld [vmem:[#allocation10 + $0x1f8] sm:$0xff] }
  0xb5   : > { %673 = vmatpush2.msra.mxu1 %v598_v43  ;;  %537 = vmatprep.subr.mxu0 %v460_v44  ;;  %v753_v42 = vld [vmem:[#allocation10 + $0x1f0] sm:$0xff]  ;;  %v752_v43 = vld [vmem:[#allocation10 + $0x1e8] sm:$0xff]  ;;  %v751_v44 = vld [vmem:[#allocation10 + $0x1e0] sm:$0xff] }
  0xb6   : > { %674 = vmatprep.subr.mxu1 %v597_v45  ;;  %538 = vmatpush2.msra.mxu0 %v459_v46  ;;  %v750_v45 = vld [vmem:[#allocation10 + $0x1d8] sm:$0xff]  ;;  %v749_v46 = vld [vmem:[#allocation10 + $0x1d0] sm:$0xff] }
  0xb7   : > { %675 = vmatpush2.msra.mxu1 %v596_v47  ;;  %539 = vmatprep.subr.mxu0 %v458_v48  ;;  %v748_v47 = vld [vmem:[#allocation10 + $0x1c8] sm:$0xff]  ;;  %v747_v48 = vld [vmem:[#allocation10 + $0x1c0] sm:$0xff] }
  0xb8   : > { %676 = vmatprep.subr.mxu1 %v595_v49  ;;  %540 = vmatpush2.msra.mxu0 %v457_v50  ;;  %v746_v49 = vld [vmem:[#allocation10 + $0x1b8] sm:$0xff]  ;;  %v745_v50 = vld [vmem:[#allocation10 + $0x1b0] sm:$0xff] }
  0xb9   : > { %677 = vmatpush2.msra.mxu1 %v594_v51  ;;  %541 = vmatprep.subr.mxu0 %v456_v52  ;;  %v744_v51 = vld [vmem:[#allocation10 + $0x1a8] sm:$0xff]  ;;  %v743_v52 = vld [vmem:[#allocation10 + $0x1a0] sm:$0xff] }
  0xba   : > { %678 = vmatprep.subr.mxu1 %v593_v53  ;;  %542 = vmatpush2.msra.mxu0 %v455_v54  ;;  %v742_v53 = vld [vmem:[#allocation10 + $0x198] sm:$0xff]  ;;  %v741_v54 = vld [vmem:[#allocation10 + $0x190] sm:$0xff] }
  0xbb   : > { %679 = vmatpush2.msra.mxu1 %v592_v55  ;;  %543 = vmatprep.subr.mxu0 %v454_v56  ;;  %v740_v55 = vld [vmem:[#allocation10 + $0x188] sm:$0xff]  ;;  %v739_v56 = vld [vmem:[#allocation10 + $0x180] sm:$0xff] }
  0xbc   : > { %680 = vmatprep.subr.mxu1 %v591_v57  ;;  %544 = vmatpush2.msra.mxu0 %v453_v58  ;;  %v738_v57 = vld [vmem:[#allocation10 + $0x178] sm:$0xff]  ;;  %v737_v58 = vld [vmem:[#allocation10 + $0x170] sm:$0xff] }
  0xbd   : > { %681 = vmatpush2.msra.mxu1 %v590_v59  ;;  %545 = vmatprep.subr.mxu0 %v452_v60  ;;  %v736_v59 = vld [vmem:[#allocation10 + $0x168] sm:$0xff]  ;;  %v735_v60 = vld [vmem:[#allocation10 + $0x160] sm:$0xff] }
  0xbe   : > { %682 = vmatprep.subr.mxu1 %v589_v61  ;;  %546 = vmatpush2.msra.mxu0 %v451_v62  ;;  %v734_v61 = vld [vmem:[#allocation10 + $0x158] sm:$0xff]  ;;  %v733_v62 = vld [vmem:[#allocation10 + $0x150] sm:$0xff] }
  0xbf   : > { %547 = vmatprep.mubr.f32.mxu0 %v418_v63  ;;  %683 = vmatpush2.msra.mxu1 %v588_v0  ;;  %v731_v0 = vld [vmem:[#allocation10 + $0x140] sm:$0xff] }
  0xc0   : > { %684 = vmatprep.mubr.f32.mxu1 %v418_v63  ;;  %548 = vmatmul.mubr.f32.vlgmr.msra.gmra.mxu0 %v4485_v1 }
  0xc1   : > { %685 = vmatmul.mubr.f32.vlgmr.msra.gmra.mxu1 %v4485_v1  ;;  %819 = vmatprep.mubr.f32.mxu0 %v418_v63  ;;  %v732_v63 = vld [vmem:[#allocation10 + $0x148] sm:$0xff] }
  0xc2   : > { %755 = vmatprep.subr.mxu0 %v722_v5  ;;  %3730 = vmatprep.subr.mxu1 %v4244_v15  ;;  %v729_v5 = vld [vmem:[#allocation10 + $0x130] sm:$0xff] }
  0xc3   : > { %756 = vmatpush1.msra.mxu0 %v721_v6  ;;  %3732 = vmatprep.mubr.msk.f32.mxu1 %vm4245_vm0, %v4244_v15  ;;  %v728_v6 = vld [vmem:[#allocation10 + $0x128] sm:$0xff] }
  0xc4   : > { %757 = vmatprep.subr.mxu0 %v720_v7  ;;  %v727_v7 = vld [vmem:[#allocation10 + $0x120] sm:$0xff] }
  0xc5   : > { %758 = vmatpush1.msra.mxu0 %v719_v8  ;;  %v726_v8 = vld [vmem:[#allocation10 + $0x118] sm:$0xff] }
  0xc6   : > { %759 = vmatprep.subr.mxu0 %v718_v11  ;;  %v724_v11 = vld [vmem:[#allocation10 + $0x108] sm:$0xff] }
  0xc7   : > { %760 = vmatpush1.msra.mxu0 %v717_v12  ;;  %v723_v12 = vld [vmem:[#allocation10 + $0x100] sm:$0xff] }
  0xc8   : > { %761 = vmatprep.subr.mxu0 %v716_v14  ;;  %v4246_v14 = vmov 1983009808  }
  0xc9   : > { %762 = vmatpush1.msra.mxu0 %v715_v16  ;;  %v849_v16 = vunpack.c.l.s4 %v4246_v14 }
  0xca   : > { %763 = vmatprep.subr.mxu0 %v714_v17  ;;  %v851_v17 = vlaneseq }
  0xcb   : > { %764 = vmatpush1.msra.mxu0 %v713_v18  ;;  %v850_v18 = vunpack.c.0.s8 %v849_v16 }
  0xcc   : > { %765 = vmatprep.subr.mxu0 %v712_v19  ;;  %v4525_v19 = vshrl.u32 %v851_v17, 7 }
  0xcd   : > { %766 = vmatpush1.msra.mxu0 %v711_v20 }
  0xce   : > { %767 = vmatprep.subr.mxu0 %v710_v21 }
  0xcf   : > { %768 = vmatpush1.msra.mxu0 %v709_v22  ;;  %v4247_v22 = vmov 1934713408  }
  0xd0   : > { %769 = vmatprep.subr.mxu0 %v708_v23  ;;  %v913_v23 = vunpack.c.l.s4 %v4247_v22 }
  0xd1   : > { %770 = vmatpush1.msra.mxu0 %v707_v24  ;;  %v4528_v24 = vsub.s32 %v850_v18, %v4525_v19 }
  0xd2   : > { %771 = vmatprep.subr.mxu0 %v706_v25 }
  0xd3   : > { %772 = vmatpush1.msra.mxu0 %v705_v26 }
  0xd4   : > { %773 = vmatprep.subr.mxu0 %v704_v27 }
  0xd5   : > { %774 = vmatpush1.msra.mxu0 %v703_v28  ;;  %v914_v28 = vunpack.c.0.s8 %v913_v23 }
  0xd6   : > { %775 = vmatprep.subr.mxu0 %v702_v29 }
  0xd7   : > { %776 = vmatpush1.msra.mxu0 %v701_v30 }
  0xd8   : > { %777 = vmatprep.subr.mxu0 %v700_v31 }
  0xd9   : > { %778 = vmatpush1.msra.mxu0 %v699_v32 }
  0xda   : > { %779 = vmatprep.subr.mxu0 %v698_v33 }
  0xdb   : > { %780 = vmatpush1.msra.mxu0 %v697_v34 }
  0xdc   : > { %781 = vmatprep.subr.mxu0 %v696_v35  ;;  %v4537_v35 = vsub.s32 %v914_v28, %v4525_v19 }
  0xdd   : > { %782 = vmatpush1.msra.mxu0 %v695_v36 }
  0xde   : > { %783 = vmatprep.subr.mxu0 %v694_v37 }
  0xdf   : > { %784 = vmatpush1.msra.mxu0 %v693_v38 }
  0xe0   : > { %785 = vmatprep.subr.mxu0 %v692_v39 }
  0xe1   : > { %786 = vmatpush1.msra.mxu0 %v691_v40 }
  0xe2   : > { %787 = vmatprep.subr.mxu0 %v754_v41 }
  0xe3   : > { %788 = vmatpush2.msra.mxu0 %v753_v42 }
  0xe4   : > { %789 = vmatprep.subr.mxu0 %v752_v43 }
  0xe5   : > { %790 = vmatpush2.msra.mxu0 %v751_v44 }
  0xe6   : > { %791 = vmatprep.subr.mxu0 %v750_v45 }
  0xe7   : > { %792 = vmatpush2.msra.mxu0 %v749_v46 }
  0xe8   : > { %793 = vmatprep.subr.mxu0 %v748_v47 }
  0xe9   : > { %794 = vmatpush2.msra.mxu0 %v747_v48 }
  0xea   : > { %795 = vmatprep.subr.mxu0 %v746_v49 }
  0xeb   : > { %796 = vmatpush2.msra.mxu0 %v745_v50 }
  0xec   : > { %797 = vmatprep.subr.mxu0 %v744_v51 }
  0xed   : > { %798 = vmatpush2.msra.mxu0 %v743_v52 }
  0xee   : > { %799 = vmatprep.subr.mxu0 %v742_v53 }
  0xef   : > { %800 = vmatpush2.msra.mxu0 %v741_v54 }
  0xf0   : > { %801 = vmatprep.subr.mxu0 %v740_v55 }
  0xf1   : > { %802 = vmatpush2.msra.mxu0 %v739_v56 }
  0xf2   : > { %803 = vmatprep.subr.mxu0 %v738_v57 }
  0xf3   : > { %804 = vmatpush2.msra.mxu0 %v737_v58 }
  0xf4   : > { %805 = vmatprep.subr.mxu0 %v736_v59 }
  0xf5   : > { %806 = vmatpush2.msra.mxu0 %v735_v60 }
  0xf6   : > { %807 = vmatprep.subr.mxu0 %v734_v61 }
  0xf7   : > { %808 = vmatpush2.msra.mxu0 %v733_v62 }
  0xf8   : > { %809 = vmatprep.subr.mxu0 %v732_v63 }
  0xf9   : > { %810 = vmatpush2.msra.mxu0 %v731_v0 }
 0x180   : > { %v549_v2 = vpop.f32.mrf.mxu0 }
 0x181   : > { %v4489_v3 = vpop.f32.mrf.mxu1  ;;  %v4491_v4 = vmul.f32 0.0625, %v549_v2  ;;  %v730_v2 = vld [vmem:[#allocation10 + $0x138] sm:$0xff] }
 0x182   : > { %1125 = vrot.lane.b32.xlu1 %v4489_v3, %s4241_s30  ;;  %1119 = vrot.lane.b32.xlu0 %v4489_v3, %s4242_s18  ;;  %v551_v9 = vpop.f32.mrf.mxu0 }
 0x183   : > { %v4505_v10 = vpop.f32.mrf.mxu1  ;;  %v4511_v13 = vmul.f32 0.0625, %v551_v9  ;;  %811 = vmatprep.subr.mxu0 %v730_v2  ;;  %v725_v9 = vld [vmem:[#allocation10 + $0x110] sm:$0xff] }
 0x184   : > { %812 = vmatpush2.msra.mxu0 %v729_v5 }
 0x185   : > { %813 = vmatprep.subr.mxu0 %v728_v6 }
 0x186   : > { %827 = vrot.lane.b32.xlu1 %v4491_v4, %s4242_s18  ;;  %1122 = vrot.lane.b32.xlu0 %v4489_v3, %s4243_s11 }
 0x187   : > { %814 = vmatpush2.msra.mxu0 %v727_v7 }
 0x188   : > { %815 = vmatprep.subr.mxu0 %v726_v8 }
 0x189   : > { %816 = vmatpush2.msra.mxu0 %v725_v9 }
 0x18a   : > { %833 = vrot.lane.b32.xlu1 %v4491_v4, %s4241_s30  ;;  %830 = vrot.lane.b32.xlu0 %v4491_v4, %s4243_s11 }
 0x18b   : > { %817 = vmatprep.subr.mxu0 %v724_v11 }
 0x18c   : > { %818 = vmatpush2.msra.mxu0 %v723_v12 }
 0x18d   : > { %820 = vmatmul.mubr.f32.vlgmr.msra.gmra.mxu0 %v4485_v1 }
 0x18e   : > { %1132 = vrot.lane.b32.xlu1 %v4505_v10, %s4243_s11  ;;  %1129 = vrot.lane.b32.xlu0 %v4505_v10, %s4242_s18 }
 0x192   : > { %837 = vrot.lane.b32.xlu1 %v4511_v13, %s4242_s18  ;;  %1135 = vrot.lane.b32.xlu0 %v4505_v10, %s4241_s30 }
 0x196   : > { %843 = vrot.lane.b32.xlu1 %v4511_v13, %s4241_s30  ;;  %840 = vrot.lane.b32.xlu0 %v4511_v13, %s4243_s11 }
 0x1f4   : > { %v1126_v20 = vpop.permute.xlu1 %1125  ;;  %v1120_v21 = vpop.permute.xlu0 %1119 }
 0x1f5   : > { %v1154_v25 = vcombine.low %v1120_v21, %v1126_v20  ;;  %v1155_v26 = vcombine.high %v1120_v21, %v1126_v20 }
 0x1f7   : > { %v1162_v31 = vrot.slane %v1154_v25, %v4528_v24  ;;  %v1169_v32 = vrot.slane %v1155_v26, %v4528_v24 }
 0x1f8   : > { %v828_v27 = vpop.permute.xlu1 %827  ;;  %v1123_v29 = vpop.permute.xlu0 %1122 }
 0x1f9   : > { %v1138_v1 = vcombine.low %v4489_v3, %v1123_v29  ;;  %v1139_v30 = vcombine.high %v4489_v3, %v1123_v29 }
 0x1fb   : > { %v1146_v33 = vrot.slane %v1138_v1, %v4528_v24  ;;  %v1153_v34 = vrot.slane %v1139_v30, %v4528_v24 }
 0x1fc   : > { %v834_v36 = vpop.permute.xlu1 %833  ;;  %v831_v37 = vpop.permute.xlu0 %830 }
 0x1fd   : > { %v1202_v38 = vcombine.low %v1146_v33, %v1162_v31  ;;  %v1203_v39 = vcombine.high %v1146_v33, %v1162_v31  ;;  %v1218_v40 = vcombine.low %v1153_v34, %v1169_v32  ;;  %v1219_v41 = vcombine.high %v1153_v34, %v1169_v32 }
 0x1fe   : > { %v862_v42 = vcombine.low %v828_v27, %v834_v36  ;;  %v863_v43 = vcombine.high %v828_v27, %v834_v36  ;;  %v846_v3 = vcombine.low %v4491_v4, %v831_v37  ;;  %v847_v44 = vcombine.high %v4491_v4, %v831_v37 }
 0x1ff   : > { %v1210_v51 = vrot.slane %v1202_v38, %v4537_v35  ;;  %v1217_v52 = vrot.slane %v1203_v39, %v4537_v35  ;;  %v1226_v53 = vrot.slane %v1218_v40, %v4537_v35  ;;  %v1233_v54 = vrot.slane %v1219_v41, %v4537_v35 }
 0x200   : > { %v870_v45 = vrot.slane %v862_v42, %v4528_v24  ;;  %v877_v46 = vrot.slane %v863_v43, %v4528_v24  ;;  %v854_v47 = vrot.slane %v846_v3, %v4528_v24  ;;  %v861_v48 = vrot.slane %v847_v44, %v4528_v24  ;;  %v1133_v49 = vpop.permute.xlu1 %1132  ;;  %v1130_v50 = vpop.permute.xlu0 %1129 }
 0x201   : > { %v3643_v0 = vcombine.low %v1210_v51, %v1217_v52  ;;  %v3645_v2 = vcombine.high %v1210_v51, %v1217_v52  ;;  %v3647_v5 = vcombine.low %v1226_v53, %v1233_v54  ;;  %v3649_v6 = vcombine.high %v1226_v53, %v1233_v54 }
 0x202   : > { %v910_v55 = vcombine.low %v854_v47, %v870_v45  ;;  %v911_v4 = vcombine.high %v854_v47, %v870_v45  ;;  %v926_v56 = vcombine.low %v861_v48, %v877_v46  ;;  %v927_v57 = vcombine.high %v861_v48, %v877_v46 }
 0x203   : > { %v1170_v12 = vcombine.low %v4505_v10, %v1133_v49  ;;  %v1171_v14 = vcombine.high %v4505_v10, %v1133_v49  ;;  %v4556_v18 = vrot.slane %v3643_v0, %v4528_v24  ;;  %v4559_v20 = vrot.slane %v3645_v2, %v4528_v24 }
 0x204   : > { %v918_v58 = vrot.slane %v910_v55, %v4537_v35  ;;  %v925_v59 = vrot.slane %v911_v4, %v4537_v35  ;;  %v934_v60 = vrot.slane %v926_v56, %v4537_v35  ;;  %v941_v61 = vrot.slane %v927_v57, %v4537_v35  ;;  %v838_v62 = vpop.permute.xlu1 %837  ;;  %v1136_v63 = vpop.permute.xlu0 %1135 }
 0x205   : > { %v1186_v16 = vcombine.low %v1130_v50, %v1136_v63  ;;  %v1187_v17 = vcombine.high %v1130_v50, %v1136_v63  ;;  %v4564_v26 = vrot.slane %v3647_v5, %v4528_v24  ;;  %v4567_v27 = vrot.slane %v3649_v6, %v4528_v24 }
 0x206   : > { %v3635_v7 = vcombine.low %v918_v58, %v925_v59  ;;  %v3637_v8 = vcombine.high %v918_v58, %v925_v59  ;;  %v3639_v9 = vcombine.low %v934_v60, %v941_v61  ;;  %v3641_v11 = vcombine.high %v934_v60, %v941_v61 }
 0x207   : > { %v1194_v21 = vrot.slane %v1186_v16, %v4528_v24  ;;  %v1201_v22 = vrot.slane %v1187_v17, %v4528_v24  ;;  %v1178_v30 = vrot.slane %v1170_v12, %v4528_v24  ;;  %v1185_v31 = vrot.slane %v1171_v14, %v4528_v24 }
 0x208   : > { %v844_v23 = vpop.permute.xlu1 %843  ;;  %v841_v25 = vpop.permute.xlu0 %840  ;;  %v4570_v10 = vrot.slane %v3635_v7, %v4528_v24  ;;  %v4573_v28 = vrot.slane %v3637_v8, %v4528_v24  ;;  %v4576_v29 = vrot.slane %v3639_v9, %v4528_v24  ;;  %v4579_v1 = vrot.slane %v3641_v11, %v4528_v24 }
 0x209   : > { %v894_v32 = vcombine.low %v838_v62, %v844_v23  ;;  %v895_v33 = vcombine.high %v838_v62, %v844_v23  ;;  %v878_v34 = vcombine.low %v4511_v13, %v841_v25  ;;  %v879_v36 = vcombine.high %v4511_v13, %v841_v25 }
 0x20a   : > { %v1234_v37 = vcombine.low %v1178_v30, %v1194_v21  ;;  %v1235_v38 = vcombine.high %v1178_v30, %v1194_v21  ;;  %v1250_v39 = vcombine.low %v1185_v31, %v1201_v22  ;;  %v1251_v40 = vcombine.high %v1185_v31, %v1201_v22 }
 0x20b   : > { %v902_v41 = vrot.slane %v894_v32, %v4528_v24  ;;  %v909_v42 = vrot.slane %v895_v33, %v4528_v24  ;;  %v886_v43 = vrot.slane %v878_v34, %v4528_v24  ;;  %v893_v3 = vrot.slane %v879_v36, %v4528_v24 }
 0x20c   : > { %v1338_v48 = vcombine.low %v4556_v18, %v4559_v20  ;;  %v1370_v13 = vcombine.low %v4564_v26, %v4567_v27  ;;  %v1046_v49 = vcombine.low %v4570_v10, %v4573_v28  ;;  %v1078_v50 = vcombine.low %v4576_v29, %v4579_v1 }
 0x20d   : > { %v942_v44 = vcombine.low %v886_v43, %v902_v41  ;;  %v943_v45 = vcombine.high %v886_v43, %v902_v41  ;;  %v958_v46 = vcombine.low %v893_v3, %v909_v42  ;;  %v959_v47 = vcombine.high %v893_v3, %v909_v42 }
 0x20e   : > { %v1242_v51 = vrot.slane %v1234_v37, %v4537_v35  ;;  %v1249_v52 = vrot.slane %v1235_v38, %v4537_v35  ;;  %v1258_v53 = vrot.slane %v1250_v39, %v4537_v35  ;;  %v1265_v54 = vrot.slane %v1251_v40, %v4537_v35 }
 0x20f   : > { %v950_v55 = vrot.slane %v942_v44, %v4537_v35  ;;  %v957_v4 = vrot.slane %v943_v45, %v4537_v35  ;;  %v966_v56 = vrot.slane %v958_v46, %v4537_v35  ;;  %v973_v57 = vrot.slane %v959_v47, %v4537_v35 }
 0x210   : > { %v1346_v58 = vrot.slane %v1338_v48, %v4537_v35  ;;  %v1378_v59 = vrot.slane %v1370_v13, %v4537_v35  ;;  %v1054_v60 = vrot.slane %v1046_v49, %v4537_v35  ;;  %v1086_v61 = vrot.slane %v1078_v50, %v4537_v35 }
 0x211   : > { %v3644_v62 = vcombine.low %v1242_v51, %v1249_v52  ;;  %v3646_v63 = vcombine.high %v1242_v51, %v1249_v52  ;;  %v3648_v0 = vcombine.low %v1258_v53, %v1265_v54  ;;  %v1339_v2 = vcombine.high %v4556_v18, %v4559_v20 }
 0x212   : > { %v1371_v5 = vcombine.high %v4564_v26, %v4567_v27  ;;  %v3650_v6 = vcombine.high %v1258_v53, %v1265_v54  ;;  %v1402_v7 = vcombine.low %v1346_v58, %v1378_v59  ;;  %v1047_v8 = vcombine.high %v4570_v10, %v4573_v28 }
 0x213   : > { %v1110_v9 = vcombine.low %v1054_v60, %v1086_v61  ;;  %v1079_v11 = vcombine.high %v4576_v29, %v4579_v1  ;;  %v3636_v12 = vcombine.low %v950_v55, %v957_v4  ;;  %v3638_v14 = vcombine.high %v950_v55, %v957_v4 }
 0x214   : > { %v3640_v16 = vcombine.low %v966_v56, %v973_v57  ;;  %3731 = vmatpush3.xpose.msk.msra.mxu1 %vm1702_vm1, %v1402_v7  ;;  %v1289_v17 = vrot.slane %v3644_v62, %v4528_v24  ;;  %v1305_v18 = vrot.slane %v3646_v63, %v4528_v24  ;;  %v1321_v20 = vrot.slane %v3648_v0, %v4528_v24 }
 0x215   : > { %v3642_v21 = vcombine.high %v966_v56, %v973_v57  ;;  %3735 = vmatprep.subr.mxu1 %v4244_v15  ;;  %v1337_v22 = vrot.slane %v3650_v6, %v4528_v24  ;;  %v1403_v23 = vcombine.high %v1346_v58, %v1378_v59  ;;  %v1353_v25 = vrot.slane %v1339_v2, %v4537_v35  ;;  %v2311_v58 = vld [vmem:[%s4465_s9] sm:$0x3] }
 0x216   : > { %v1385_v26 = vrot.slane %v1371_v5, %v4537_v35  ;;  %v997_v27 = vrot.slane %v3636_v12, %v4528_v24  ;;  %v1013_v10 = vrot.slane %v3638_v14, %v4528_v24  ;;  %v1029_v28 = vrot.slane %v3640_v16, %v4528_v24 }
 0x217   : > { %3733 = vmatmul.mubr.msk.f32.vlgmr.msra.gmra.mxu1 %vm1702_vm1, %v1110_v9  ;;  %v1045_v29 = vrot.slane %v3642_v21, %v4528_v24  ;;  %v1111_v1 = vcombine.high %v1054_v60, %v1086_v61  ;;  %v1061_v30 = vrot.slane %v1047_v8, %v4537_v35  ;;  %v1093_v31 = vrot.slane %v1079_v11, %v4537_v35 }
 0x218   : > { %3736 = vmatpush3.xpose.msk.msra.mxu1 %vm1702_vm1, %v1403_v23  ;;  %3737 = vmatprep.mubr.msk.f32.mxu1 %vm4245_vm0, %v4244_v15  ;;  %v1354_v32 = vcombine.low %v1289_v17, %v1305_v18  ;;  %v1386_v33 = vcombine.low %v1321_v20, %v1337_v22  ;;  %v1404_v34 = vcombine.low %v1353_v25, %v1385_v26  ;;  %v4248_v59 = vmov 0  }
 0x219   : > { %3740 = vmatprep.subr.mxu1 %v4244_v15  ;;  %v1062_v36 = vcombine.low %v997_v27, %v1013_v10  ;;  %v1094_v37 = vcombine.low %v1029_v28, %v1045_v29  ;;  %v1112_v38 = vcombine.low %v1061_v30, %v1093_v31  ;;  %v1405_v39 = vcombine.high %v1353_v25, %v1385_v26 }
 0x21a   : > { %v1362_v40 = vrot.slane %v1354_v32, %v4537_v35  ;;  %v1394_v41 = vrot.slane %v1386_v33, %v4537_v35  ;;  %v1113_v42 = vcombine.high %v1061_v30, %v1093_v31  ;;  %v1355_v44 = vcombine.high %v1289_v17, %v1305_v18 }
 0x21b   : > { %3738 = vmatmul.mubr.msk.f32.vlgmr.msra.gmra.mxu1 %vm1702_vm1, %v1111_v1  ;;  %v1070_v43 = vrot.slane %v1062_v36, %v4537_v35  ;;  %v1102_v3 = vrot.slane %v1094_v37, %v4537_v35  ;;  %v1387_v45 = vcombine.high %v1321_v20, %v1337_v22  ;;  %v1063_v47 = vcombine.high %v997_v27, %v1013_v10 }
 0x21c   : > { %3741 = vmatpush3.xpose.msk.msra.mxu1 %vm1702_vm1, %v1404_v34  ;;  %3742 = vmatprep.mubr.msk.f32.mxu1 %vm4245_vm0, %v4244_v15  ;;  %v1406_v46 = vcombine.low %v1362_v40, %v1394_v41  ;;  %v1095_v48 = vcombine.high %v1029_v28, %v1045_v29  ;;  %v1407_v49 = vcombine.high %v1362_v40, %v1394_v41 }
 0x21d   : > { %3745 = vmatprep.subr.mxu1 %v4244_v15  ;;  %v1114_v13 = vcombine.low %v1070_v43, %v1102_v3  ;;  %v1369_v50 = vrot.slane %v1355_v44, %v4537_v35  ;;  %v1401_v51 = vrot.slane %v1387_v45, %v4537_v35  ;;  %v1115_v52 = vcombine.high %v1070_v43, %v1102_v3 }
 0x21e   : > { %v1077_v53 = vrot.slane %v1063_v47, %v4537_v35  ;;  %v1109_v54 = vrot.slane %v1095_v48, %v4537_v35  ;;  %vm2312_vm2 = vnez %v2311_v58 }
 0x21f   : > { %3743 = vmatmul.mubr.msk.f32.vlgmr.msra.gmra.mxu1 %vm1702_vm1, %v1112_v38  ;;  %v1408_v55 = vcombine.low %v1369_v50, %v1401_v51  ;;  %v1409_v56 = vcombine.high %v1369_v50, %v1401_v51  ;;  %v2313_v60 = vsel %vm2312_vm2, 16843009, %v4248_v59 }
 0x220   : > { %3746 = vmatpush3.xpose.msk.msra.mxu1 %vm1702_vm1, %v1405_v39  ;;  %3747 = vmatprep.mubr.msk.f32.mxu1 %vm4245_vm0, %v4244_v15  ;;  %v1116_v4 = vcombine.low %v1077_v53, %v1109_v54  ;;  %v1117_v57 = vcombine.high %v1077_v53, %v1109_v54  ;;  %v2314_v61 = vunpack.c.0.s8 %v2313_v60 }
 0x221   : > { %3750 = vmatprep.subr.mxu1 %v4244_v15 }
 0x222   : > { %vm4678_vm3 = vcmp.ne.s32.totalorder %v2314_v61, 0 }
 0x223   : > { %3748 = vmatmul.mubr.msk.f32.vlgmr.msra.gmra.mxu1 %vm1702_vm1, %v1113_v42 }
 0x224   : > { %3751 = vmatpush3.xpose.msk.msra.mxu1 %vm1702_vm1, %v1406_v46  ;;  %3752 = vmatprep.mubr.msk.f32.mxu1 %vm4245_vm0, %v4244_v15 }
 0x225   : > { %3755 = vmatprep.subr.mxu1 %v4244_v15 }
 0x227   : > { %3753 = vmatmul.mubr.msk.f32.vlgmr.msra.gmra.mxu1 %vm1702_vm1, %v1114_v13 }
 0x228   : > { %3756 = vmatpush3.xpose.msk.msra.mxu1 %vm1702_vm1, %v1407_v49  ;;  %3757 = vmatprep.mubr.msk.f32.mxu1 %vm4245_vm0, %v4244_v15 }
 0x229   : > { %3760 = vmatprep.subr.mxu1 %v4244_v15 }
 0x22b   : > { %3758 = vmatmul.mubr.msk.f32.vlgmr.msra.gmra.mxu1 %vm1702_vm1, %v1115_v52 }
 0x22c   : > { %3761 = vmatpush3.xpose.msk.msra.mxu1 %vm1702_vm1, %v1408_v55  ;;  %3762 = vmatprep.mubr.msk.f32.mxu1 %vm4245_vm0, %v4244_v15 }
 0x22d   : > { %3765 = vmatprep.subr.mxu1 %v4244_v15 }
 0x22f   : > { %3763 = vmatmul.mubr.msk.f32.vlgmr.msra.gmra.mxu1 %vm1702_vm1, %v1116_v4 }
 0x230   : > { %3766 = vmatpush3.xpose.msk.msra.mxu1 %vm1702_vm1, %v1409_v56  ;;  %3767 = vmatprep.mubr.msk.f32.mxu1 %vm4245_vm0, %v4244_v15 }
 0x231   : > { %3770 = vmatprep.subr.mxu1 %v4244_v15 }
 0x233   : > { %3768 = vmatmul.mubr.msk.f32.vlgmr.msra.gmra.mxu1 %vm1702_vm1, %v1117_v57 }
 0x234   : > { %3772 = vmatprep.mubr.msk.f32.mxu1 %vm4245_vm0, %v4244_v15 }
 0x24d   : > { %v821_v38 = vpop.f32.mrf.mxu0 }
 0x24f   : > { %v4711_v39 = vpop.f32.mrf.mxu0 }
 0x2d7   : > { %v1775_v63 = vpop.f32.mrf.mxu1 }
 0x2d8   : > { %v2318_v0 = vsel %vm4678_vm3, %v1775_v63, -6.25e+18 }
 0x2d9   : > { %v3734_v2 = vpop.f32.mrf.mxu1  ;;  %v2327_v5 = vsel %vm2326_vm4, %v2318_v0, -inf }
 0x2da   : > { %2328 = vmax.xlane.f32.xlu0 %v2327_v5 }
 0x2db   : > { %v1851_v6 = vpop.f32.mrf.mxu1 }
 0x2dc   : > { %v2319_v7 = vsel %vm4678_vm3, %v1851_v6, -6.25e+18 }
 0x2dd   : > { %v3739_v8 = vpop.f32.mrf.mxu1  ;;  %v2330_v9 = vsel %vm2326_vm4, %v2319_v7, -inf }
 0x2de   : > { %2331 = vmax.xlane.f32.xlu1 %v2330_v9 }
 0x2df   : > { %v1927_v11 = vpop.f32.mrf.mxu1 }
 0x2e0   : > { %v2320_v12 = vsel %vm4678_vm3, %v1927_v11, -6.25e+18 }
 0x2e1   : > { %v3744_v14 = vpop.f32.mrf.mxu1  ;;  %v2333_v16 = vsel %vm2326_vm4, %v2320_v12, -inf }
 0x2e2   : > { %2334 = vmax.xlane.f32.xlu0 %v2333_v16 }
 0x2e3   : > { %v2003_v17 = vpop.f32.mrf.mxu1 }
 0x2e4   : > { %v2321_v18 = vsel %vm4678_vm3, %v2003_v17, -6.25e+18 }
 0x2e5   : > { %v3749_v20 = vpop.f32.mrf.mxu1  ;;  %v2336_v21 = vsel %vm2326_vm4, %v2321_v18, -inf }
 0x2e6   : > { %2337 = vmax.xlane.f32.xlu0 %v2336_v21 }
 0x2e7   : > { %v2079_v22 = vpop.f32.mrf.mxu1 }
 0x2e8   : > { %v2322_v23 = vsel %vm4678_vm3, %v2079_v22, -6.25e+18 }
 0x2e9   : > { %v3754_v25 = vpop.f32.mrf.mxu1  ;;  %v2339_v26 = vsel %vm2326_vm4, %v2322_v23, -inf }
 0x2ea   : > { %2340 = vmax.xlane.f32.xlu1 %v2339_v26 }
 0x2eb   : > { %v2155_v27 = vpop.f32.mrf.mxu1 }
 0x2ec   : > { %v2323_v10 = vsel %vm4678_vm3, %v2155_v27, -6.25e+18 }
 0x2ed   : > { %v3759_v28 = vpop.f32.mrf.mxu1  ;;  %v2342_v29 = vsel %vm2326_vm4, %v2323_v10, -inf }
 0x2ee   : > { %2343 = vmax.xlane.f32.xlu0 %v2342_v29 }
 0x2ef   : > { %v2231_v1 = vpop.f32.mrf.mxu1 }
 0x2f0   : > { %v2324_v30 = vsel %vm4678_vm3, %v2231_v1, -6.25e+18 }
 0x2f1   : > { %v3764_v31 = vpop.f32.mrf.mxu1  ;;  %v2345_v32 = vsel %vm2326_vm4, %v2324_v30, -inf }
 0x2f2   : > { %2346 = vmax.xlane.f32.xlu1 %v2345_v32 }
 0x2f3   : > { %v2307_v33 = vpop.f32.mrf.mxu1 }
 0x2f4   : > { %v4705_v34 = vsel %vm4678_vm3, %v2307_v33, -6.25e+18 }
 0x2f5   : > { %v3769_v36 = vpop.f32.mrf.mxu1  ;;  %v2348_v37 = vsel %vm2326_vm4, %v4705_v34, -inf }
 0x2f6   : > { %2349 = vmax.xlane.f32.xlu0 %v2348_v37 }
 0x303   : > { %1414 = vrot.lane.b32.xlu1 %v821_v38, %s4243_s11 }
 0x307   : > { %1417 = vrot.lane.b32.xlu1 %v821_v38, %s4241_s30 }
 0x30b   : > { %1421 = vrot.lane.b32.xlu1 %v4711_v39, %s4242_s18 }
 0x30c   : > { %1411 = vrot.lane.b32.xlu0 %v821_v38, %s4242_s18 }
 0x363   : > { %v2329_v40 = vpop.xlane.xlu0 %2328 }
 0x364   : > { %v2351_v41 = vsub.f32 %v2318_v0, %v2329_v40 }
 0x366   : > { %v2359_v42 = vmul.f32 1.442695, %v2351_v41 }
 0x367   : > { %v2332_v43 = vpop.xlane.xlu1 %2331 }
 0x368   : > { %3943 = vpow2.f32 %v2359_v42  ;;  %v2352_v3 = vsub.f32 %v2319_v7, %v2332_v43 }
 0x36a   : > { %v2361_v44 = vmul.f32 1.442695, %v2352_v3 }
 0x36b   : > { %v2335_v45 = vpop.xlane.xlu0 %2334 }
 0x36c   : > { %3945 = vpow2.f32 %v2361_v44  ;;  %v2353_v46 = vsub.f32 %v2320_v12, %v2335_v45 }
 0x36e   : > { %v2363_v47 = vmul.f32 1.442695, %v2353_v46 }
 0x36f   : > { %v2338_v48 = vpop.xlane.xlu0 %2337 }
 0x370   : > { %3947 = vpow2.f32 %v2363_v47  ;;  %v2354_v13 = vsub.f32 %v2321_v18, %v2338_v48 }
 0x372   : > { %v2365_v49 = vmul.f32 1.442695, %v2354_v13 }
 0x373   : > { %v2341_v50 = vpop.xlane.xlu1 %2340 }
 0x374   : > { %3949 = vpow2.f32 %v2365_v49  ;;  %v2355_v51 = vsub.f32 %v2322_v23, %v2341_v50 }
 0x375   : > { %v4716_v52 = vpop.eup %3943 }
 0x376   : > { %v2367_v53 = vmul.f32 1.442695, %v2355_v51  ;;  %v2375_v54 = vsel %vm2326_vm4, %v4716_v52, 0.0 }
 0x377   : > { %v2344_v55 = vpop.xlane.xlu0 %2343  ;;  %2376 = vadd.xlane.f32.xlu1 %v2375_v54 }
 0x378   : > { %3951 = vpow2.f32 %v2367_v53  ;;  %v2356_v4 = vsub.f32 %v2323_v10, %v2344_v55 }
 0x379   : > { %v4720_v56 = vpop.eup %3945 }
 0x37a   : > { %v2369_v57 = vmul.f32 1.442695, %v2356_v4  ;;  %v2378_v58 = vsel %vm2326_vm4, %v4720_v56, 0.0 }
 0x37b   : > { %v2347_v59 = vpop.xlane.xlu1 %2346  ;;  %2379 = vadd.xlane.f32.xlu0 %v2378_v58 }
 0x37c   : > { %3953 = vpow2.f32 %v2369_v57  ;;  %v2357_v60 = vsub.f32 %v2324_v30, %v2347_v59 }
 0x37d   : > { %v4724_v61 = vpop.eup %3947 }
 0x37e   : > { %v2371_v62 = vmul.f32 1.442695, %v2357_v60  ;;  %v2381_v63 = vsel %vm2326_vm4, %v4724_v61, 0.0 }
 0x37f   : > { %2382 = vadd.xlane.f32.xlu1 %v2381_v63  ;;  %v1415_v0 = vpop.permute.xlu1 %1414  ;;  %v2350_v2 = vpop.xlane.xlu0 %2349 }
 0x380   : > { %3955 = vpow2.f32 %v2371_v62  ;;  %v1430_v6 = vcombine.low %v821_v38, %v1415_v0  ;;  %v1431_v7 = vcombine.high %v821_v38, %v1415_v0  ;;  %v2358_v4 = vsub.f32 %v4705_v34, %v2350_v2 }
 0x381   : > { %v4728_v5 = vpop.eup %3949 }
 0x382   : > { %v2384_v8 = vsel %vm2326_vm4, %v4728_v5, 0.0  ;;  %v1438_v17 = vrot.slane %v1430_v6, %v4528_v24  ;;  %v1445_v18 = vrot.slane %v1431_v7, %v4528_v24  ;;  %v2373_v57 = vmul.f32 1.442695, %v2358_v4 }
 0x383   : > { %v1418_v9 = vpop.permute.xlu1 %1417  ;;  %2385 = vadd.xlane.f32.xlu0 %v2384_v8  ;;  %v1412_v11 = vpop.permute.xlu0 %1411 }
 0x384   : > { %v1446_v12 = vcombine.low %v1412_v11, %v1418_v9  ;;  %v1447_v14 = vcombine.high %v1412_v11, %v1418_v9  ;;  %3957 = vpow2.f32 %v2373_v57 }
 0x385   : > { %v4732_v16 = vpop.eup %3951 }
 0x386   : > { %v1454_v20 = vrot.slane %v1446_v12, %v4528_v24  ;;  %v1461_v21 = vrot.slane %v1447_v14, %v4528_v24  ;;  %v2387_v22 = vsel %vm2326_vm4, %v4732_v16, 0.0 }
 0x387   : > { %2388 = vadd.xlane.f32.xlu1 %v2387_v22  ;;  %v1422_v60 = vpop.permute.xlu1 %1421 }
 0x388   : > { %v1494_v23 = vcombine.low %v1438_v17, %v1454_v20  ;;  %v1495_v25 = vcombine.high %v1438_v17, %v1454_v20  ;;  %v1510_v26 = vcombine.low %v1445_v18, %v1461_v21  ;;  %v1511_v27 = vcombine.high %v1445_v18, %v1461_v21 }
 0x389   : > { %v4740_v10 = vpop.eup %3953 }
 0x38a   : > { %v1502_v28 = vrot.slane %v1494_v23, %v4537_v35  ;;  %v1509_v29 = vrot.slane %v1495_v25, %v4537_v35  ;;  %v1518_v1 = vrot.slane %v1510_v26, %v4537_v35  ;;  %v1525_v30 = vrot.slane %v1511_v27, %v4537_v35 }
 0x38b   : > { %v2390_v31 = vsel %vm2326_vm4, %v4740_v10, 0.0 }
 0x38c   : > { %v3651_v32 = vcombine.low %v1502_v28, %v1509_v29  ;;  %v3653_v33 = vcombine.high %v1502_v28, %v1509_v29  ;;  %v3655_v36 = vcombine.low %v1518_v1, %v1525_v30  ;;  %v3657_v37 = vcombine.high %v1518_v1, %v1525_v30  ;;  %2391 = vadd.xlane.f32.xlu0 %v2390_v31 }
 0x38d   : > { %v4748_v38 = vpop.eup %3955 }
 0x38e   : > { %v1574_v40 = vrot.slane %v3651_v32, %v4528_v24  ;;  %v1590_v41 = vrot.slane %v3653_v33, %v4528_v24  ;;  %v1606_v42 = vrot.slane %v3655_v36, %v4528_v24  ;;  %v1622_v43 = vrot.slane %v3657_v37, %v4528_v24 }
 0x38f   : > { %v2393_v3 = vsel %vm2326_vm4, %v4748_v38, 0.0 }
 0x390   : > { %2394 = vadd.xlane.f32.xlu0 %v2393_v3  ;;  %v1630_v44 = vcombine.low %v1574_v40, %v1590_v41  ;;  %v1662_v45 = vcombine.low %v1606_v42, %v1622_v43  ;;  %v1631_v46 = vcombine.high %v1574_v40, %v1590_v41  ;;  %v1663_v47 = vcombine.high %v1606_v42, %v1622_v43 }
 0x391   : > { %v4766_v58 = vpop.eup %3957 }
 0x392   : > { %v1638_v48 = vrot.slane %v1630_v44, %v4537_v35  ;;  %v1670_v13 = vrot.slane %v1662_v45, %v4537_v35  ;;  %v1645_v49 = vrot.slane %v1631_v46, %v4537_v35  ;;  %v1677_v50 = vrot.slane %v1663_v47, %v4537_v35 }
 0x393   : > { %v2396_v59 = vsel %vm2326_vm4, %v4766_v58, 0.0 }
 0x394   : > { %v1694_v51 = vcombine.low %v1638_v48, %v1670_v13  ;;  %v1695_v53 = vcombine.high %v1638_v48, %v1670_v13  ;;  %v1696_v54 = vcombine.low %v1645_v49, %v1677_v50  ;;  %v1697_v55 = vcombine.high %v1645_v49, %v1677_v50 }
 0x396   : > { %3771 = vmatpush3.msra.mxu1 %v1694_v51 }
 0x397   : > { %3775 = vmatprep.subr.mxu1 %v4244_v15 }
 0x398   : > { %1427 = vrot.lane.b32.xlu1 %v4711_v39, %s4241_s30 }
 0x3a6   : > { %1424 = vrot.lane.b32.xlu0 %v4711_v39, %s4243_s11 }
 0x3bc   : > { %2397 = vadd.xlane.f32.xlu1 %v2396_v59 }
 0x400   : > { %v2377_v62 = vpop.xlane.xlu1 %2376 }
 0x401   : > { %3959 = vrcp.f32 %v2377_v62 }
 0x404   : > { %v2380_v63 = vpop.xlane.xlu0 %2379 }
 0x405   : > { %3961 = vrcp.f32 %v2380_v63 }
 0x408   : > { %v2383_v0 = vpop.xlane.xlu1 %2382 }
 0x409   : > { %3963 = vrcp.f32 %v2383_v0 }
 0x40c   : > { %v2386_v6 = vpop.xlane.xlu0 %2385 }
 0x40d   : > { %3965 = vrcp.f32 %v2386_v6 }
 0x40e   : > { %v3960_v34 = vpop.eup %3959 }
 0x40f   : > { %v2407_v2 = vmul.f32 %v3960_v34, %v4716_v52  ;;  %v3334_v34 = vld [vmem:[#allocation11 + $0xf8] sm:$0xff] }
 0x410   : > { %v2389_v8 = vpop.xlane.xlu1 %2388  ;;  %3379 = vmatprep.subr.mxu0 %v3334_v34 }
 0x411   : > { %3773 = vmatmul.mubr.msk.f32.vlgmr.msra.gmra.mxu1 %vm2326_vm4, %v2407_v2  ;;  %3967 = vrcp.f32 %v2389_v8  ;;  %v3333_v2 = vld [vmem:[#allocation11 + $0xf0] sm:$0xff]  ;;  %v3331_v8 = vld [vmem:[#allocation11 + $0xe0] sm:$0xff] }
 0x412   : > { %v3962_v7 = vpop.eup %3961  ;;  %3776 = vmatpush3.msra.mxu1 %v1695_v53  ;;  %3777 = vmatprep.mubr.msk.f32.mxu1 %vm4245_vm0, %v4244_v15 }
 0x413   : > { %3780 = vmatprep.subr.mxu1 %v4244_v15  ;;  %v2408_v9 = vmul.f32 %v3962_v7, %v4720_v56  ;;  %v3332_v7 = vld [vmem:[#allocation11 + $0xe8] sm:$0xff]  ;;  %3380 = vmatpush1.msra.mxu0 %v3333_v2 }
 0x414   : > { %v1428_v14 = vpop.permute.xlu1 %1427  ;;  %3381 = vmatprep.subr.mxu0 %v3332_v7  ;;  %v3351_v7 = vld [vmem:[#allocation11 + $0x180] sm:$0xff] }
 0x415   : > { %v2392_v11 = vpop.xlane.xlu0 %2391  ;;  %3778 = vmatmul.mubr.msk.f32.vlgmr.msra.gmra.mxu1 %vm2326_vm4, %v2408_v9  ;;  %v1478_v20 = vcombine.low %v1422_v60, %v1428_v14  ;;  %v1479_v21 = vcombine.high %v1422_v60, %v1428_v14  ;;  %v3329_v9 = vld [vmem:[#allocation11 + $0xd0] sm:$0xff]  ;;  %3382 = vmatpush1.msra.mxu0 %v3331_v8  ;;  %v3323_v14 = vld [vmem:[#allocation11 + $0xa0] sm:$0xff]  ;;  %v3350_v8 = vld [vmem:[#allocation11 + $0x178] sm:$0xff] }
 0x416   : > { %v3964_v12 = vpop.eup %3963  ;;  %3781 = vmatpush3.msra.mxu1 %v1696_v54  ;;  %3782 = vmatprep.mubr.msk.f32.mxu1 %vm4245_vm0, %v4244_v15  ;;  %3969 = vrcp.f32 %v2392_v11  ;;  %v3328_v11 = vld [vmem:[#allocation11 + $0xc8] sm:$0xff] }
 0x417   : > { %3785 = vmatprep.subr.mxu1 %v4244_v15  ;;  %v2409_v52 = vmul.f32 %v3964_v12, %v4724_v61  ;;  %v1486_v25 = vrot.slane %v1478_v20, %v4528_v24  ;;  %v1493_v26 = vrot.slane %v1479_v21, %v4528_v24  ;;  %v3326_v12 = vld [vmem:[#allocation11 + $0xb8] sm:$0xff]  ;;  %v3319_v20 = vld [vmem:[#allocation11 + $0x80] sm:$0xff] }
 0x418   : > { %v3318_v21 = vld [vmem:[#allocation11 + $0x78] sm:$0xff] }
 0x419   : > { %v2395_v17 = vpop.xlane.xlu0 %2394  ;;  %3783 = vmatmul.mubr.msk.f32.vlgmr.msra.gmra.mxu1 %vm2326_vm4, %v2409_v52  ;;  %v3325_v52 = vld [vmem:[#allocation11 + $0xb0] sm:$0xff] }
 0x41a   : > { %v3966_v18 = vpop.eup %3965  ;;  %3786 = vmatpush3.msra.mxu1 %v1697_v55  ;;  %3787 = vmatprep.mubr.msk.f32.mxu1 %vm4245_vm0, %v4244_v15  ;;  %3971 = vrcp.f32 %v2395_v17  ;;  %v3322_v17 = vld [vmem:[#allocation11 + $0x98] sm:$0xff] }
 0x41b   : > { %v2410_v56 = vmul.f32 %v3966_v18, %v4728_v5  ;;  %3790 = vmatprep.subr.mxu1 %v4244_v15  ;;  %v3321_v18 = vld [vmem:[#allocation11 + $0x90] sm:$0xff] }
 0x41d   : > { %v1425_v22 = vpop.permute.xlu0 %1424  ;;  %3788 = vmatmul.mubr.msk.f32.vlgmr.msra.gmra.mxu1 %vm2326_vm4, %v2410_v56  ;;  %v3320_v56 = vld [vmem:[#allocation11 + $0x88] sm:$0xff] }
 0x41e   : > { %v1462_v61 = vcombine.low %v4711_v39, %v1425_v22  ;;  %v1463_v23 = vcombine.high %v4711_v39, %v1425_v22  ;;  %3792 = vmatprep.mubr.msk.f32.mxu1 %vm4245_vm0, %v4244_v15  ;;  %v3968_v47 = vpop.eup %3967  ;;  %v3317_v22 = vld [vmem:[#allocation11 + $0x70] sm:$0xff] }
 0x41f   : > { %v2411_v53 = vmul.f32 %v3968_v47, %v4732_v16  ;;  %v3360_v47 = vld [vmem:[#allocation11 + $0x1c8] sm:$0xff] }
 0x420   : > { %v1470_v5 = vrot.slane %v1462_v61, %v4528_v24  ;;  %v1477_v27 = vrot.slane %v1463_v23, %v4528_v24  ;;  %v3316_v61 = vld [vmem:[#allocation11 + $0x68] sm:$0xff]  ;;  %v3315_v23 = vld [vmem:[#allocation11 + $0x60] sm:$0xff] }
 0x422   : > { %v1526_v28 = vcombine.low %v1470_v5, %v1486_v25  ;;  %v1527_v29 = vcombine.high %v1470_v5, %v1486_v25  ;;  %v1542_v1 = vcombine.low %v1477_v27, %v1493_v26  ;;  %v1543_v30 = vcombine.high %v1477_v27, %v1493_v26  ;;  %v3314_v25 = vld [vmem:[#allocation11 + $0x58] sm:$0xff]  ;;  %v3313_v26 = vld [vmem:[#allocation11 + $0x50] sm:$0xff]  ;;  %v3312_v5 = vld [vmem:[#allocation11 + $0x48] sm:$0xff] }
 0x423   : > { %v3970_v54 = vpop.eup %3969  ;;  %v3311_v27 = vld [vmem:[#allocation11 + $0x40] sm:$0xff] }
 0x424   : > { %v1534_v31 = vrot.slane %v1526_v28, %v4537_v35  ;;  %v1541_v39 = vrot.slane %v1527_v29, %v4537_v35  ;;  %v1550_v32 = vrot.slane %v1542_v1, %v4537_v35  ;;  %v1557_v33 = vrot.slane %v1543_v30, %v4537_v35  ;;  %v3310_v28 = vld [vmem:[#allocation11 + $0x38] sm:$0xff]  ;;  %v3309_v29 = vld [vmem:[#allocation11 + $0x30] sm:$0xff]  ;;  %v3308_v1 = vld [vmem:[#allocation11 + $0x28] sm:$0xff] }
 0x425   : > { %v2412_v59 = vmul.f32 %v3970_v54, %v4740_v10  ;;  %v3307_v30 = vld [vmem:[#allocation11 + $0x20] sm:$0xff] }
 0x426   : > { %v3652_v36 = vcombine.low %v1534_v31, %v1541_v39  ;;  %v3654_v37 = vcombine.high %v1534_v31, %v1541_v39  ;;  %v3656_v40 = vcombine.low %v1550_v32, %v1557_v33  ;;  %v3658_v41 = vcombine.high %v1550_v32, %v1557_v33  ;;  %v3306_v31 = vld [vmem:[#allocation11 + $0x18] sm:$0xff]  ;;  %v3305_v39 = vld [vmem:[#allocation11 + $0x10] sm:$0xff]  ;;  %v3304_v32 = vld [vmem:[#allocation11 + $0x8] sm:$0xff] }
 0x427   : > { %v3972_v16 = vpop.eup %3971  ;;  %v3303_v33 = vld [vmem:[#allocation11] sm:$0xff] }
 0x428   : > { %v1581_v42 = vrot.slane %v3652_v36, %v4528_v24  ;;  %v1597_v43 = vrot.slane %v3654_v37, %v4528_v24  ;;  %v1613_v3 = vrot.slane %v3656_v40, %v4528_v24  ;;  %v1629_v44 = vrot.slane %v3658_v41, %v4528_v24  ;;  %v3366_v37 = vld [vmem:[#allocation11 + $0x1f8] sm:$0xff]  ;;  %v3365_v40 = vld [vmem:[#allocation11 + $0x1f0] sm:$0xff] }
 0x429   : > { %v2413_v62 = vmul.f32 %v3972_v16, %v4748_v38  ;;  %v3330_v38 = vld [vmem:[#allocation11 + $0xd8] sm:$0xff] }
 0x42a   : > { %v1646_v45 = vcombine.low %v1581_v42, %v1597_v43  ;;  %v1678_v46 = vcombine.low %v1613_v3, %v1629_v44  ;;  %v1647_v49 = vcombine.high %v1581_v42, %v1597_v43  ;;  %v1679_v50 = vcombine.high %v1613_v3, %v1629_v44  ;;  %3383 = vmatprep.subr.mxu0 %v3330_v38  ;;  %v3364_v42 = vld [vmem:[#allocation11 + $0x1e8] sm:$0xff]  ;;  %v3363_v43 = vld [vmem:[#allocation11 + $0x1e0] sm:$0xff]  ;;  %v3362_v44 = vld [vmem:[#allocation11 + $0x1d8] sm:$0xff] }
 0x42b   : > { %3384 = vmatpush1.msra.mxu0 %v3329_v9 }
 0x42c   : > { %v1654_v48 = vrot.slane %v1646_v45, %v4537_v35  ;;  %v1686_v13 = vrot.slane %v1678_v46, %v4537_v35  ;;  %v1661_v4 = vrot.slane %v1647_v49, %v4537_v35  ;;  %v1693_v57 = vrot.slane %v1679_v50, %v4537_v35  ;;  %3385 = vmatprep.subr.mxu0 %v3328_v11  ;;  %v3361_v45 = vld [vmem:[#allocation11 + $0x1d0] sm:$0xff]  ;;  %v3358_v49 = vld [vmem:[#allocation11 + $0x1b8] sm:$0xff] }
 0x42d   : > { %v3357_v50 = vld [vmem:[#allocation11 + $0x1b0] sm:$0xff] }
 0x42e   : > { %v1698_v51 = vcombine.low %v1654_v48, %v1686_v13  ;;  %v1699_v55 = vcombine.high %v1654_v48, %v1686_v13  ;;  %v1700_v60 = vcombine.low %v1661_v4, %v1693_v57  ;;  %v1701_v63 = vcombine.high %v1661_v4, %v1693_v57  ;;  %v3359_v48 = vld [vmem:[#allocation11 + $0x1c0] sm:$0xff] }
 0x42f   : > { %v3355_v4 = vld [vmem:[#allocation11 + $0x1a0] sm:$0xff] }
 0x430   : > { %3791 = vmatpush3.msra.mxu1 %v1698_v51 }
 0x431   : > { %3793 = vmatmul.mubr.msk.f32.vlgmr.msra.gmra.mxu1 %vm2326_vm4, %v2411_v53  ;;  %3795 = vmatprep.subr.mxu1 %v4244_v15  ;;  %v3356_v53 = vld [vmem:[#allocation11 + $0x1a8] sm:$0xff] }
 0x432   : > { %3796 = vmatpush3.msra.mxu1 %v1699_v55  ;;  %3797 = vmatprep.mubr.msk.f32.mxu1 %vm4245_vm0, %v4244_v15 }
 0x433   : > { %3800 = vmatprep.subr.mxu1 %v4244_v15 }
 0x435   : > { %3798 = vmatmul.mubr.msk.f32.vlgmr.msra.gmra.mxu1 %vm2326_vm4, %v2412_v59  ;;  %v3354_v59 = vld [vmem:[#allocation11 + $0x198] sm:$0xff] }
 0x436   : > { %3801 = vmatpush3.msra.mxu1 %v1700_v60  ;;  %3802 = vmatprep.mubr.msk.f32.mxu1 %vm4245_vm0, %v4244_v15 }
 0x437   : > { %3805 = vmatprep.subr.mxu1 %v4244_v15 }
 0x439   : > { %3803 = vmatmul.mubr.msk.f32.vlgmr.msra.gmra.mxu1 %vm2326_vm4, %v2413_v62  ;;  %v3353_v62 = vld [vmem:[#allocation11 + $0x190] sm:$0xff] }
 0x43a   : > { %3806 = vmatpush3.msra.mxu1 %v1701_v63  ;;  %3807 = vmatprep.mubr.msk.f32.mxu1 %vm4245_vm0, %v4244_v15  ;;  %v3327_v15 = vld [vmem:[#allocation11 + $0xc0] sm:$0xff] }
 0x43b   : > { %3386 = vmatpush1.msra.mxu0 %v3327_v15 }
 0x43c   : > { %3387 = vmatprep.subr.mxu0 %v3326_v12  ;;  %v3349_v12 = vld [vmem:[#allocation11 + $0x170] sm:$0xff] }
 0x43d   : > { %3388 = vmatpush1.msra.mxu0 %v3325_v52  ;;  %v3348_v52 = vld [vmem:[#allocation11 + $0x168] sm:$0xff] }
 0x445   : > { %v2398_v10 = vpop.xlane.xlu1 %2397 }
 0x446   : > { %3973 = vrcp.f32 %v2398_v10  ;;  %v3352_v10 = vld [vmem:[#allocation11 + $0x188] sm:$0xff] }
 0x453   : > { %v3974_v0 = vpop.eup %3973 }
 0x454   : > { %v2414_v6 = vmul.f32 %v3974_v0, %v4766_v58  ;;  %v3324_v58 = vld [vmem:[#allocation11 + $0xa8] sm:$0xff] }
 0x455   : > { %3389 = vmatprep.subr.mxu0 %v3324_v58 }
 0x456   : > { %3808 = vmatmul.mubr.msk.f32.vlgmr.msra.gmra.mxu1 %vm2326_vm4, %v2414_v6  ;;  %3390 = vmatpush1.msra.mxu0 %v3323_v14 }
 0x457   : > { %3391 = vmatprep.subr.mxu0 %v3322_v17 }
 0x458   : > { %3392 = vmatpush1.msra.mxu0 %v3321_v18 }
 0x459   : > { %3393 = vmatprep.subr.mxu0 %v3320_v56  ;;  %v3347_v56 = vld [vmem:[#allocation11 + $0x160] sm:$0xff] }
 0x45a   : > { %3394 = vmatpush1.msra.mxu0 %v3319_v20 }
 0x45b   : > { %3395 = vmatprep.subr.mxu0 %v3318_v21 }
 0x45c   : > { %3396 = vmatpush1.msra.mxu0 %v3317_v22 }
 0x45d   : > { %3397 = vmatprep.subr.mxu0 %v3316_v61 }
 0x45e   : > { %3398 = vmatpush1.msra.mxu0 %v3315_v23 }
 0x45f   : > { %3399 = vmatprep.subr.mxu0 %v3314_v25 }
 0x460   : > { %3400 = vmatpush1.msra.mxu0 %v3313_v26 }
 0x461   : > { %3401 = vmatprep.subr.mxu0 %v3312_v5 }
 0x462   : > { %3402 = vmatpush1.msra.mxu0 %v3311_v27 }
 0x463   : > { %3403 = vmatprep.subr.mxu0 %v3310_v28 }
 0x464   : > { %3404 = vmatpush1.msra.mxu0 %v3309_v29 }
 0x465   : > { %3405 = vmatprep.subr.mxu0 %v3308_v1 }
 0x466   : > { %3406 = vmatpush1.msra.mxu0 %v3307_v30 }
 0x467   : > { %3407 = vmatprep.subr.mxu0 %v3306_v31 }
 0x468   : > { %3408 = vmatpush1.msra.mxu0 %v3305_v39 }
 0x469   : > { %3409 = vmatprep.subr.mxu0 %v3304_v32 }
 0x46a   : > { %3410 = vmatpush1.msra.mxu0 %v3303_v33 }
 0x46b   : > { %3411 = vmatprep.subr.mxu0 %v3366_v37 }
 0x46c   : > { %3412 = vmatpush2.msra.mxu0 %v3365_v40 }
 0x46d   : > { %3413 = vmatprep.subr.mxu0 %v3364_v42 }
 0x46e   : > { %3414 = vmatpush2.msra.mxu0 %v3363_v43 }
 0x46f   : > { %3415 = vmatprep.subr.mxu0 %v3362_v44 }
 0x470   : > { %3416 = vmatpush2.msra.mxu0 %v3361_v45 }
 0x471   : > { %3417 = vmatprep.subr.mxu0 %v3360_v47 }
 0x472   : > { %3418 = vmatpush2.msra.mxu0 %v3359_v48 }
 0x473   : > { %3419 = vmatprep.subr.mxu0 %v3358_v49 }
 0x474   : > { %3420 = vmatpush2.msra.mxu0 %v3357_v50 }
 0x475   : > { %3421 = vmatprep.subr.mxu0 %v3356_v53 }
 0x476   : > { %3422 = vmatpush2.msra.mxu0 %v3355_v4 }
 0x477   : > { %3423 = vmatprep.subr.mxu0 %v3354_v59 }
 0x478   : > { %3424 = vmatpush2.msra.mxu0 %v3353_v62 }
 0x479   : > { %3425 = vmatprep.subr.mxu0 %v3352_v10 }
 0x47a   : > { %3426 = vmatpush2.msra.mxu0 %v3351_v7  ;;  %v3346_v7 = vld [vmem:[#allocation11 + $0x158] sm:$0xff] }
 0x47b   : > { %3427 = vmatprep.subr.mxu0 %v3350_v8  ;;  %v3345_v8 = vld [vmem:[#allocation11 + $0x150] sm:$0xff] }
 0x47c   : > { %3428 = vmatpush2.msra.mxu0 %v3349_v12 }
 0x47d   : > { %3429 = vmatprep.subr.mxu0 %v3348_v52  ;;  %v3343_v52 = vld [vmem:[#allocation11 + $0x140] sm:$0xff] }
 0x47e   : > { %3430 = vmatpush2.msra.mxu0 %v3347_v56 }
 0x47f   : > { %3431 = vmatprep.subr.mxu0 %v3346_v7 }
 0x480   : > { %3432 = vmatpush2.msra.mxu0 %v3345_v8 }
 0x4d1   : > { %v2484_v36 = vpop.f32.mrf.mxu1 }
 0x4d3   : > { %v3774_v41 = vpop.f32.mrf.mxu1 }
 0x4d5   : > { %v2557_v3 = vpop.f32.mrf.mxu1 }
 0x4d7   : > { %v3779_v46 = vpop.f32.mrf.mxu1 }
 0x4d9   : > { %v2630_v13 = vpop.f32.mrf.mxu1 }
 0x4da   : > { %v2999_v54 = vcombine.low %v2484_v36, %v2630_v13  ;;  %v3000_v55 = vcombine.high %v2484_v36, %v2630_v13 }
 0x4db   : > { %v3784_v51 = vpop.f32.mrf.mxu1 }
 0x4dc   : > { %v3007_v0 = vrot.slane %v2999_v54, %v4528_v24  ;;  %v3014_v6 = vrot.slane %v3000_v55, %v4528_v24 }
 0x4dd   : > { %v2703_v57 = vpop.f32.mrf.mxu1 }
 0x4de   : > { %v3015_v16 = vcombine.low %v2557_v3, %v2703_v57  ;;  %v3016_v60 = vcombine.high %v2557_v3, %v2703_v57 }
 0x4df   : > { %v3789_v63 = vpop.f32.mrf.mxu1 }
 0x4e0   : > { %v3023_v34 = vrot.slane %v3015_v16, %v4528_v24  ;;  %v3030_v2 = vrot.slane %v3016_v60, %v4528_v24 }
 0x4e2   : > { %v3063_v38 = vcombine.low %v3007_v0, %v3023_v34  ;;  %v3064_v9 = vcombine.high %v3007_v0, %v3023_v34  ;;  %v3079_v11 = vcombine.low %v3014_v6, %v3030_v2  ;;  %v3080_v15 = vcombine.high %v3014_v6, %v3030_v2 }
 0x4e4   : > { %v3071_v58 = vrot.slane %v3063_v38, %v4537_v35  ;;  %v3078_v14 = vrot.slane %v3064_v9, %v4537_v35  ;;  %v3087_v17 = vrot.slane %v3079_v11, %v4537_v35  ;;  %v3094_v18 = vrot.slane %v3080_v15, %v4537_v35  ;;  %v3344_v38 = vld [vmem:[#allocation11 + $0x148] sm:$0xff] }
 0x4e5   : > { %3433 = vmatprep.subr.mxu0 %v3344_v38 }
 0x4e6   : > { %v3683_v20 = vcombine.low %v3071_v58, %v3078_v14  ;;  %v3685_v21 = vcombine.high %v3071_v58, %v3078_v14  ;;  %v3687_v22 = vcombine.low %v3087_v17, %v3094_v18  ;;  %v3689_v61 = vcombine.high %v3087_v17, %v3094_v18  ;;  %v3342_v58 = vld [vmem:[#allocation11 + $0x138] sm:$0xff]  ;;  %3434 = vmatpush2.msra.mxu0 %v3343_v52 }
 0x4e7   : > { %3435 = vmatprep.subr.mxu0 %v3342_v58 }
 0x4e8   : > { %v3143_v23 = vrot.slane %v3683_v20, %v4528_v24  ;;  %v3159_v25 = vrot.slane %v3685_v21, %v4528_v24  ;;  %v3175_v26 = vrot.slane %v3687_v22, %v4528_v24  ;;  %v3191_v5 = vrot.slane %v3689_v61, %v4528_v24  ;;  %v3341_v20 = vld [vmem:[#allocation11 + $0x130] sm:$0xff]  ;;  %v3340_v21 = vld [vmem:[#allocation11 + $0x128] sm:$0xff] }
 0x4e9   : > { %3436 = vmatpush2.msra.mxu0 %v3341_v20 }
 0x4ea   : > { %v3199_v27 = vcombine.low %v3143_v23, %v3159_v25  ;;  %v3231_v28 = vcombine.low %v3175_v26, %v3191_v5  ;;  %v3200_v29 = vcombine.high %v3143_v23, %v3159_v25  ;;  %v3232_v1 = vcombine.high %v3175_v26, %v3191_v5  ;;  %v3339_v25 = vld [vmem:[#allocation11 + $0x120] sm:$0xff]  ;;  %v3338_v26 = vld [vmem:[#allocation11 + $0x118] sm:$0xff]  ;;  %3437 = vmatprep.subr.mxu0 %v3340_v21 }
 0x4eb   : > { %3438 = vmatpush2.msra.mxu0 %v3339_v25 }
 0x4ec   : > { %v4837_v30 = vrot.slane %v3199_v27, %v4537_v35  ;;  %v4840_v31 = vrot.slane %v3231_v28, %v4537_v35  ;;  %v4843_v39 = vrot.slane %v3200_v29, %v4537_v35  ;;  %v4846_v32 = vrot.slane %v3232_v1, %v4537_v35  ;;  %v3337_v28 = vld [vmem:[#allocation11 + $0x110] sm:$0xff]  ;;  %v3336_v29 = vld [vmem:[#allocation11 + $0x108] sm:$0xff]  ;;  %3439 = vmatprep.subr.mxu0 %v3338_v26 }
 0x4ed   : > { %3440 = vmatpush2.msra.mxu0 %v3337_v28 }
 0x4ee   : > { %v3263_v33 = vcombine.low %v4837_v30, %v4840_v31  ;;  %v3264_v36 = vcombine.high %v4837_v30, %v4840_v31  ;;  %v3265_v37 = vcombine.low %v4843_v39, %v4846_v32  ;;  %v3266_v40 = vcombine.high %v4843_v39, %v4846_v32  ;;  %3441 = vmatprep.subr.mxu0 %v3336_v29  ;;  %v3367_v30 = vld [vmem:[%s4942_s6] sm:$0x3] }
 0x4ef   : > { %v3375_v31 = vsub.s32 1, %v4525_v19 }
 0x4f1   : > { %v2776_v41 = vpop.f32.mrf.mxu1 }
 0x4f3   : > { %v3794_v42 = vpop.f32.mrf.mxu1 }
 0x4f4   : > { %v3335_v42 = vld [vmem:[#allocation11 + $0x100] sm:$0xff] }
 0x4f5   : > { %v2849_v43 = vpop.f32.mrf.mxu1  ;;  %3442 = vmatpush2.msra.mxu0 %v3335_v42 }
 0x4f7   : > { %v3799_v3 = vpop.f32.mrf.mxu1 }
 0x4f9   : > { %v2922_v44 = vpop.f32.mrf.mxu1 }
 0x4fa   : > { %v3031_v46 = vcombine.low %v2776_v41, %v2922_v44  ;;  %v3032_v47 = vcombine.high %v2776_v41, %v2922_v44 }
 0x4fb   : > { %v3804_v45 = vpop.f32.mrf.mxu1 }
 0x4fc   : > { %v3039_v51 = vrot.slane %v3031_v46, %v4528_v24  ;;  %v3046_v53 = vrot.slane %v3032_v47, %v4528_v24 }
 0x516   : > { %v2995_v48 = vpop.f32.mrf.mxu1 }
 0x517   : > { %v3047_v13 = vcombine.low %v2849_v43, %v2995_v48  ;;  %v3048_v49 = vcombine.high %v2849_v43, %v2995_v48 }
 0x518   : > { %v3809_v50 = vpop.f32.mrf.mxu1 }
 0x519   : > { %v3055_v54 = vrot.slane %v3047_v13, %v4528_v24  ;;  %v3062_v55 = vrot.slane %v3048_v49, %v4528_v24 }
 0x51b   : > { %v3095_v4 = vcombine.low %v3039_v51, %v3055_v54  ;;  %v3096_v57 = vcombine.high %v3039_v51, %v3055_v54  ;;  %v3111_v59 = vcombine.low %v3046_v53, %v3062_v55  ;;  %v3112_v16 = vcombine.high %v3046_v53, %v3062_v55 }
 0x51c   : > { %v3371_v54 = vsub.s32 0, %v4525_v19  ;;  %v3376_v55 = vrot.slane %v3367_v30, %v3375_v31 }
 0x51d   : > { %v3103_v60 = vrot.slane %v3095_v4, %v4537_v35  ;;  %v3110_v62 = vrot.slane %v3096_v57, %v4537_v35  ;;  %v3119_v63 = vrot.slane %v3111_v59, %v4537_v35  ;;  %v3126_v10 = vrot.slane %v3112_v16, %v4537_v35 }
 0x51f   : > { %v3684_v0 = vcombine.low %v3103_v60, %v3110_v62  ;;  %v3686_v6 = vcombine.high %v3103_v60, %v3110_v62  ;;  %v3688_v34 = vcombine.low %v3119_v63, %v3126_v10  ;;  %v3690_v2 = vcombine.high %v3119_v63, %v3126_v10 }
 0x521   : > { %v3150_v9 = vrot.slane %v3684_v0, %v4528_v24  ;;  %v3166_v11 = vrot.slane %v3686_v6, %v4528_v24  ;;  %v3182_v15 = vrot.slane %v3688_v34, %v4528_v24  ;;  %v3198_v12 = vrot.slane %v3690_v2, %v4528_v24 }
 0x523   : > { %v3215_v14 = vcombine.low %v3150_v9, %v3166_v11  ;;  %v3247_v17 = vcombine.low %v3182_v15, %v3198_v12  ;;  %v3216_v18 = vcombine.high %v3150_v9, %v3166_v11  ;;  %v3248_v56 = vcombine.high %v3182_v15, %v3198_v12 }
 0x525   : > { %v3223_v22 = vrot.slane %v3215_v14, %v4537_v35  ;;  %v3255_v61 = vrot.slane %v3247_v17, %v4537_v35  ;;  %v3230_v23 = vrot.slane %v3216_v18, %v4537_v35  ;;  %v3262_v24 = vrot.slane %v3248_v56, %v4537_v35 }
 0x527   : > { %v3268_v5 = vcombine.high %v3223_v22, %v3255_v61  ;;  %v3267_v27 = vcombine.low %v3223_v22, %v3255_v61  ;;  %v3269_v41 = vcombine.low %v3230_v23, %v3262_v24  ;;  %v3270_v43 = vcombine.high %v3230_v23, %v3262_v24 }
 0x529   : > { %v3928_v1 = vpack.i.bf16 %v3264_v36, %v3268_v5  ;;  %v3933_v35 = vpack.i.bf16 %v3265_v37, %v3269_v41  ;;  %v3938_v3 = vpack.i.bf16 %v3266_v40, %v3270_v43 }
 0x52b   : > { %3929 = vrot.lane.b32.xlu0 %v3928_v1, %s4241_s30 }
 0x52f   : > { %3934 = vrot.lane.b32.xlu0 %v3933_v35, %s4243_s11 }
 0x533   : > { %3939 = vrot.lane.b32.xlu0 %v3938_v3, %s4242_s18 }
 0x59d   : > { %v3930_v36 = vpop.permute.xlu0 %3929 }
 0x59e   : > { %v3932_v45 = vunpack.i.h.bf16 %v3930_v36  ;;  %v3931_v46 = vunpack.i.l.bf16 %v3930_v36 }
 0x5a0   : > { %v3295_v37 = vsel %vm1702_vm1, %v3263_v33, %v3932_v45  ;;  %v3300_v32 = vsel %vm1702_vm1, %v3267_v27, %v3931_v46  ;;  %v3372_v33 = vrot.slane %v3367_v30, %v3371_v54 }
 0x5a1   : > { %v3935_v44 = vpop.permute.xlu0 %3934 }
 0x5a2   : > { %v3937_v47 = vunpack.i.h.bf16 %v3935_v44  ;;  %v3936_v48 = vunpack.i.l.bf16 %v3935_v44 }
 0x5a4   : > { %v3301_v40 = vsel %vm3296_vm5, %v3300_v32, %v3936_v48  ;;  %v3297_v50 = vsel %vm3296_vm5, %v3295_v37, %v3937_v47 }
 0x5a5   : > { %v3940_v13 = vpop.permute.xlu0 %3939 }
 0x5a6   : > { %v3942_v49 = vunpack.i.h.bf16 %v3940_v13  ;;  %v3941_v39 = vunpack.i.l.bf16 %v3940_v13 }
 0x5a8   : > { %v3302_v51 = vsel %vm3298_vm6, %v3301_v40, %v3941_v39  ;;  %v3299_v53 = vsel %vm3298_vm6, %v3297_v50, %v3942_v49 }
 0x5a9   : > { %3443 = vmatprep.mubr.f32.mxu0 %v3302_v51 }
 0x5aa   : > { %3444 = vmatmul.mubr.f32.vlgmr.msra.gmra.mxu0 %v3299_v53 }
 0x66a   : > { %v3445_v4 = vpop.f32.mrf.mxu0 }
 0x66b   : > { %v3446_v57 = vadd.f32 %v3445_v4, %v3372_v33 }
 0x66c   : > { %v3447_v59 = vpop.f32.mrf.mxu0 }
 0x66d   : > { %3450 = vst [vmem:[%s406_s17] sm:$0xff] %v3446_v57  ;;  %v3448_v16 = vadd.f32 %v3447_v59, %v3376_v55 }
 0x66f   : > { %3451 = vst [vmem:[%s406_s17 + $0x8] sm:$0xff] %v3448_v16 }
 0x670   : > { %4148 = shalt.err (!%p4145_p5)
}
 0x671   : > { %s4149_s3 = scalar_lea.hbm %s3467_s22, 256  ;;  %s4153_s8 = scalar_lea.hbm %s4943_s7, 512 }
 0x672   : > { %p4150_p6 = scmp.ne.s32.totalorder %s3467_s22, %s4149_s3  ;;  %p4154_p4 = scmp.lt.s32.totalorder %s3467_s22, %s4943_s7 }
 0x673   : > { %p4155_p7 = scmp.lt.s32.totalorder %s4153_s8, %s4149_s3 }
 0x674   : > { %p4151_p13 = pnand %p4150_p6, %p4408_p2 }
 0x675   : > { %p4156_p1 = por %p4155_p7, %p4154_p4 }
 0x676   : > { %p4152_p11 = pneg %p4151_p13 }
 0x678   : > { %p4157_p3 = pnand %p4156_p1, %p4152_p11 }
 0x67a   : > { %4160 = shalt.err (!%p4157_p3)
}
 0x67b   : > { %3830 = dma.vmem_to_hbm [thread:$0]  (%p4408_p2), %s3470_s13, 256, %s3467_s22, %s3453_s2  }
 0x67c PF: > { %s3481_s18 = sand.u32 1, %s4211_s24   ;;  %p4966_p0 = scmp.ge.s32.totalorder %s4231_s29, 2 }
 0x67d   : > { %s3482_s11 = scalar_lea.sflag [#allocation4], %s3481_s18 }
 0x67e   : > { %p3853_p9 = pnand %p4966_p0, %p4415_p8 }
 0x680   : > { %p3854_p10 = pneg %p3853_p9 }
 0x682   : > { %4206 = dma.done.wait (%p3854_p10), %s3482_s11, 256  }
 0x683   : > { %4208 = vsyncadd (%p3854_p10), %s3482_s11, 4294967040  ;;  %s28_s29 = sadd.s32 1, %s4231_s29   ;;  %s4967_s21 = sld [smem:[#allocation21_spill]] }
 0x684   : > { %p25_p12 = scmp.ge.s32.totalorder %s28_s29, 4   ;;  %s4968_s23 = sld [smem:[#allocation20_spill]] }
 0x685   : > { %s4969_s24 = smov %s4215_s25  ;;  %s4970_s25 = smov %s4219_s26 }
 0x686   : > { %s4972_s27 = smov %s4227_s28  ;;  %27 = sbr.rel (!%p25_p12) target bundleno = 16 (0x10), region = 123 }
 0x689   : > { %s4971_s26 = smov %s4967_s21 }
 0x68a   : > { %s4973_s28 = smov %s4968_s23 }
 0x68b   :  { %3487 = vsyncpa [#allocation3], 1 }
 0x68c   :  { %3489 = vsyncpa [#allocation3 + $0x1], 1 }
 0x68d   :  { %3490 = vsyncpa [#allocation6], 1 }
 0x68e   :  { %3492 = vsyncpa [#allocation6 + $0x1], 1 }
 0x68f   :  { %3493 = vsyncpa [#allocation9], 1 }
 0x690   :  { %3494 = vsyncpa [#allocation12], 1 }
 0x691   :  { %3495 = vsyncpa [#allocation4], 1 }
 0x692   :  { %3497 = vsyncpa [#allocation4 + $0x1], 1 }

</bundles_post_ra>
